<compile_context>
chip_gen: v7x
topology: tpu7x:2x2x1
jax: 0.10.0
libtpu: 0.0.40
codegen_flags: <defaults>
</compile_context>

<pallas_src>
import jax
import jax.numpy as jnp
from jax import lax
from jax.experimental import pallas as pl
from jax.experimental.pallas import tpu as pltpu

K = 3  # conv kernel size; padding = 1


def _conv_bn_gelu_kernel(x_ref, w_ref, shift_ref, o_ref):
    # x_ref:     (1, H+2, W+2, Cin)   zero-padded NHWC image
    # w_ref:     (9, Cin, Cout)       conv weight (BN scale folded in), tap-major
    # shift_ref: (1, Cout)            folded per-channel shift (bias/mean/beta)
    # o_ref:     (1, H, W, Cout)
    _, H, W, Cout = o_ref.shape
    Cin = x_ref.shape[-1]

    acc = jnp.zeros((H * W, Cout), jnp.float32)
    for kh in range(K):           # statically unrolled: 9 MXU pushes per image
        for kw in range(K):
            # shifted window for this tap -> (H, W, Cin) -> (H*W, Cin)
            xs = x_ref[0, kh:kh + H, kw:kw + W, :].reshape(H * W, Cin)
            wk = w_ref[kh * K + kw]                              # (Cin, Cout)
            acc = acc + jnp.dot(xs, wk, preferred_element_type=jnp.float32)

    y = acc + shift_ref[...].astype(jnp.float32)

    inv_sqrt2 = 0.7071067811865476                               # exact erf-GELU
    g = 0.5 * y * (1.0 + lax.erf(y * inv_sqrt2))
    o_ref[...] = g.reshape(1, H, W, Cout).astype(o_ref.dtype)


def conv_bn_gelu(x, weight, conv_bias, gamma, beta, running_mean, running_var,
                 eps=1e-5):
    """x: (N, Cin, H, W) NCHW. Returns GELU(BN(Conv2d(3, pad=1)(x))): (N, Cout, H, W)."""
    N, Cin, H, W = x.shape
    Cout = weight.shape[0]

    # --- glue (plain JAX): layout + padding + parameter folding (param-sized) ---
    x_nhwc = jnp.transpose(x, (0, 2, 3, 1))                      # (N, H, W, Cin)
    x_pad = jnp.pad(x_nhwc, ((0, 0), (1, 1), (1, 1), (0, 0)))    # (N, H+2, W+2, Cin)

    inv_std = 1.0 / jnp.sqrt(running_var.astype(jnp.float32) + eps)
    scale = gamma.astype(jnp.float32) * inv_std                  # (Cout,)
    shift = (beta.astype(jnp.float32)
             + (conv_bias.astype(jnp.float32) - running_mean.astype(jnp.float32))
             * scale).reshape(1, Cout)

    # (Cout, Cin, 3, 3) -> (3, 3, Cin, Cout) -> (9, Cin, Cout), BN scale folded.
    w_taps = jnp.transpose(weight.astype(jnp.float32), (2, 3, 1, 0))
    w_taps = (w_taps * scale[None, None, None, :]).reshape(K * K, Cin, Cout)
    w_taps = w_taps.astype(x.dtype)                              # MXU-native dtype

    out_nhwc = pl.pallas_call(
        _conv_bn_gelu_kernel,
        out_shape=jax.ShapeDtypeStruct((N, H, W, Cout), x.dtype),
        grid=(N,),
        in_specs=[
            pl.BlockSpec((1, H + 2, W + 2, Cin), lambda n: (n, 0, 0, 0)),
            pl.BlockSpec((K * K, Cin, Cout), lambda n: (0, 0, 0)),
            pl.BlockSpec((1, Cout), lambda n: (0, 0)),
        ],
        out_specs=pl.BlockSpec((1, H, W, Cout), lambda n: (n, 0, 0, 0)),
        compiler_params=pltpu.CompilerParams(
            dimension_semantics=("parallel",)),
    )(x_pad, w_taps, shift)

    return jnp.transpose(out_nhwc, (0, 3, 1, 2))                 # back to NCHW


def _reference(x, weight, conv_bias, gamma, beta, running_mean, running_var,
               eps=1e-5):
    y = lax.conv_general_dilated(
        x.astype(jnp.float32), weight.astype(jnp.float32),
        window_strides=(1, 1), padding=((1, 1), (1, 1)),
        dimension_numbers=("NCHW", "OIHW", "NCHW"))
    y = y + conv_bias.reshape(1, -1, 1, 1)
    y = (y - running_mean.reshape(1, -1, 1, 1)) / jnp.sqrt(
        running_var.reshape(1, -1, 1, 1) + eps)
    y = y * gamma.reshape(1, -1, 1, 1) + beta.reshape(1, -1, 1, 1)
    return 0.5 * y * (1.0 + lax.erf(y * 0.7071067811865476))


if __name__ == "__main__":
    key = jax.random.PRNGKey(0)
    k1, k2, k3, k4, k5, k6, k7 = jax.random.split(key, 7)

    N, Cin, Cout, H, W = 2, 4, 8, 16, 16
    x = jax.random.normal(k1, (N, Cin, H, W), dtype=jnp.float32)
    weight = jax.random.normal(k2, (Cout, Cin, K, K), dtype=jnp.float32) * 0.2
    conv_bias = jax.random.normal(k3, (Cout,), dtype=jnp.float32) * 0.1
    gamma = 1.0 + 0.1 * jax.random.normal(k4, (Cout,), dtype=jnp.float32)
    beta = 0.1 * jax.random.normal(k5, (Cout,), dtype=jnp.float32)
    running_mean = 0.1 * jax.random.normal(k6, (Cout,), dtype=jnp.float32)
    running_var = 0.5 + jax.random.uniform(k7, (Cout,), dtype=jnp.float32)

    y = conv_bn_gelu(x, weight, conv_bias, gamma, beta, running_mean, running_var)
    y = jax.block_until_ready(y)

    y_ref = _reference(x, weight, conv_bias, gamma, beta, running_mean, running_var)
    assert y.shape == (N, Cout, H, W), y.shape
    assert jnp.allclose(y, y_ref, atol=1e-4, rtol=1e-4), "mismatch vs reference"

    print("KERNEL_OK")
</pallas_src>

<mosaic_0001>
module attributes {stable_mosaic.version = 11 : i64} {
  func.func @_conv_bn_gelu_kernel(%arg0: i32, %arg1: memref<1x18x18x4xf32, #tpu.memory_space<vmem>>, %arg2: memref<9x4x8xf32, #tpu.memory_space<vmem>>, %arg3: memref<1x8xf32, #tpu.memory_space<vmem>>, %arg4: memref<1x16x16x8xf32, #tpu.memory_space<vmem>>) attributes {dimension_semantics = [#tpu.dimension_semantics<parallel>], iteration_bounds = array<i64: 2>, scalar_prefetch = 0 : i64, scratch_operands = 0 : i64, tpu.core_type = #tpu.core_type<tc>, window_params = [{transform_indices = @transform_0, window_bounds = array<i64: 1, 18, 18, 4>}, {pipeline_mode = #tpu.pipeline_mode<synchronous>, transform_indices = @transform_1, window_bounds = array<i64: 9, 4, 8>}, {pipeline_mode = #tpu.pipeline_mode<synchronous>, transform_indices = @transform_2, window_bounds = array<i64: 1, 8>}, {transform_indices = @transform_3, window_bounds = array<i64: 1, 16, 16, 8>}]} {
    %cst = arith.constant 0.000000e+00 : f32
    %0 = vector.broadcast %cst : f32 to vector<256x8xf32>
    %c0 = arith.constant 0 : index
    %c0_0 = arith.constant 0 : index
    %c0_1 = arith.constant 0 : index
    %c0_2 = arith.constant 0 : index
    %1 = vector.load %arg1[%c0, %c0_0, %c0_1, %c0_2] : memref<1x18x18x4xf32, #tpu.memory_space<vmem>>, vector<1x16x16x4xf32>
    %2 = vector.shape_cast %1 : vector<1x16x16x4xf32> to vector<16x16x4xf32>
    %3 = vector.shape_cast %2 : vector<16x16x4xf32> to vector<256x4xf32>
    %c0_3 = arith.constant 0 : index
    %c0_4 = arith.constant 0 : index
    %c0_5 = arith.constant 0 : index
    %4 = vector.load %arg2[%c0_3, %c0_4, %c0_5] : memref<9x4x8xf32, #tpu.memory_space<vmem>>, vector<1x4x8xf32>
    %5 = vector.shape_cast %4 : vector<1x4x8xf32> to vector<4x8xf32>
    %cst_6 = arith.constant dense<0.000000e+00> : vector<256x8xf32>
    %6 = tpu.matmul %3, %5, %cst_6 {dimension_numbers = #tpu.dot_dimension_numbers<[1], [0], [0], [1], [0, 0, 1, 1], [], []>} : vector<256x4xf32>, vector<4x8xf32>, vector<256x8xf32> -> vector<256x8xf32>
    %7 = arith.addf %0, %6 : vector<256x8xf32>
    %c0_7 = arith.constant 0 : index
    %c0_8 = arith.constant 0 : index
    %c1 = arith.constant 1 : index
    %c0_9 = arith.constant 0 : index
    %8 = vector.load %arg1[%c0_7, %c0_8, %c1, %c0_9] : memref<1x18x18x4xf32, #tpu.memory_space<vmem>>, vector<1x16x16x4xf32>
    %9 = vector.shape_cast %8 : vector<1x16x16x4xf32> to vector<16x16x4xf32>
    %10 = vector.shape_cast %9 : vector<16x16x4xf32> to vector<256x4xf32>
    %c1_10 = arith.constant 1 : index
    %c0_11 = arith.constant 0 : index
    %c0_12 = arith.constant 0 : index
    %11 = vector.load %arg2[%c1_10, %c0_11, %c0_12] : memref<9x4x8xf32, #tpu.memory_space<vmem>>, vector<1x4x8xf32>
    %12 = vector.shape_cast %11 : vector<1x4x8xf32> to vector<4x8xf32>
    %cst_13 = arith.constant dense<0.000000e+00> : vector<256x8xf32>
    %13 = tpu.matmul %10, %12, %cst_13 {dimension_numbers = #tpu.dot_dimension_numbers<[1], [0], [0], [1], [0, 0, 1, 1], [], []>} : vector<256x4xf32>, vector<4x8xf32>, vector<256x8xf32> -> vector<256x8xf32>
    %14 = arith.addf %7, %13 : vector<256x8xf32>
    %c0_14 = arith.constant 0 : index
    %c0_15 = arith.constant 0 : index
    %c2 = arith.constant 2 : index
    %c0_16 = arith.constant 0 : index
    %15 = vector.load %arg1[%c0_14, %c0_15, %c2, %c0_16] : memref<1x18x18x4xf32, #tpu.memory_space<vmem>>, vector<1x16x16x4xf32>
    %16 = vector.shape_cast %15 : vector<1x16x16x4xf32> to vector<16x16x4xf32>
    %17 = vector.shape_cast %16 : vector<16x16x4xf32> to vector<256x4xf32>
    %c2_17 = arith.constant 2 : index
    %c0_18 = arith.constant 0 : index
    %c0_19 = arith.constant 0 : index
    %18 = vector.load %arg2[%c2_17, %c0_18, %c0_19] : memref<9x4x8xf32, #tpu.memory_space<vmem>>, vector<1x4x8xf32>
    %19 = vector.shape_cast %18 : vector<1x4x8xf32> to vector<4x8xf32>
    %cst_20 = arith.constant dense<0.000000e+00> : vector<256x8xf32>
    %20 = tpu.matmul %17, %19, %cst_20 {dimension_numbers = #tpu.dot_dimension_numbers<[1], [0], [0], [1], [0, 0, 1, 1], [], []>} : vector<256x4xf32>, vector<4x8xf32>, vector<256x8xf32> -> vector<256x8xf32>
    %21 = arith.addf %14, %20 : vector<256x8xf32>
    %c0_21 = arith.constant 0 : index
    %c1_22 = arith.constant 1 : index
    %c0_23 = arith.constant 0 : index
    %c0_24 = arith.constant 0 : index
    %22 = vector.load %arg1[%c0_21, %c1_22, %c0_23, %c0_24] : memref<1x18x18x4xf32, #tpu.memory_space<vmem>>, vector<1x16x16x4xf32>
    %23 = vector.shape_cast %22 : vector<1x16x16x4xf32> to vector<16x16x4xf32>
    %24 = vector.shape_cast %23 : vector<16x16x4xf32> to vector<256x4xf32>
    %c3 = arith.constant 3 : index
    %c0_25 = arith.constant 0 : index
    %c0_26 = arith.constant 0 : index
    %25 = vector.load %arg2[%c3, %c0_25, %c0_26] : memref<9x4x8xf32, #tpu.memory_space<vmem>>, vector<1x4x8xf32>
    %26 = vector.shape_cast %25 : vector<1x4x8xf32> to vector<4x8xf32>
    %cst_27 = arith.constant dense<0.000000e+00> : vector<256x8xf32>
    %27 = tpu.matmul %24, %26, %cst_27 {dimension_numbers = #tpu.dot_dimension_numbers<[1], [0], [0], [1], [0, 0, 1, 1], [], []>} : vector<256x4xf32>, vector<4x8xf32>, vector<256x8xf32> -> vector<256x8xf32>
    %28 = arith.addf %21, %27 : vector<256x8xf32>
    %c0_28 = arith.constant 0 : index
    %c1_29 = arith.constant 1 : index
    %c1_30 = arith.constant 1 : index
    %c0_31 = arith.constant 0 : index
    %29 = vector.load %arg1[%c0_28, %c1_29, %c1_30, %c0_31] : memref<1x18x18x4xf32, #tpu.memory_space<vmem>>, vector<1x16x16x4xf32>
    %30 = vector.shape_cast %29 : vector<1x16x16x4xf32> to vector<16x16x4xf32>
    %31 = vector.shape_cast %30 : vector<16x16x4xf32> to vector<256x4xf32>
    %c4 = arith.constant 4 : index
    %c0_32 = arith.constant 0 : index
    %c0_33 = arith.constant 0 : index
    %32 = vector.load %arg2[%c4, %c0_32, %c0_33] : memref<9x4x8xf32, #tpu.memory_space<vmem>>, vector<1x4x8xf32>
    %33 = vector.shape_cast %32 : vector<1x4x8xf32> to vector<4x8xf32>
    %cst_34 = arith.constant dense<0.000000e+00> : vector<256x8xf32>
    %34 = tpu.matmul %31, %33, %cst_34 {dimension_numbers = #tpu.dot_dimension_numbers<[1], [0], [0], [1], [0, 0, 1, 1], [], []>} : vector<256x4xf32>, vector<4x8xf32>, vector<256x8xf32> -> vector<256x8xf32>
    %35 = arith.addf %28, %34 : vector<256x8xf32>
    %c0_35 = arith.constant 0 : index
    %c1_36 = arith.constant 1 : index
    %c2_37 = arith.constant 2 : index
    %c0_38 = arith.constant 0 : index
    %36 = vector.load %arg1[%c0_35, %c1_36, %c2_37, %c0_38] : memref<1x18x18x4xf32, #tpu.memory_space<vmem>>, vector<1x16x16x4xf32>
    %37 = vector.shape_cast %36 : vector<1x16x16x4xf32> to vector<16x16x4xf32>
    %38 = vector.shape_cast %37 : vector<16x16x4xf32> to vector<256x4xf32>
    %c5 = arith.constant 5 : index
    %c0_39 = arith.constant 0 : index
    %c0_40 = arith.constant 0 : index
    %39 = vector.load %arg2[%c5, %c0_39, %c0_40] : memref<9x4x8xf32, #tpu.memory_space<vmem>>, vector<1x4x8xf32>
    %40 = vector.shape_cast %39 : vector<1x4x8xf32> to vector<4x8xf32>
    %cst_41 = arith.constant dense<0.000000e+00> : vector<256x8xf32>
    %41 = tpu.matmul %38, %40, %cst_41 {dimension_numbers = #tpu.dot_dimension_numbers<[1], [0], [0], [1], [0, 0, 1, 1], [], []>} : vector<256x4xf32>, vector<4x8xf32>, vector<256x8xf32> -> vector<256x8xf32>
    %42 = arith.addf %35, %41 : vector<256x8xf32>
    %c0_42 = arith.constant 0 : index
    %c2_43 = arith.constant 2 : index
    %c0_44 = arith.constant 0 : index
    %c0_45 = arith.constant 0 : index
    %43 = vector.load %arg1[%c0_42, %c2_43, %c0_44, %c0_45] : memref<1x18x18x4xf32, #tpu.memory_space<vmem>>, vector<1x16x16x4xf32>
    %44 = vector.shape_cast %43 : vector<1x16x16x4xf32> to vector<16x16x4xf32>
    %45 = vector.shape_cast %44 : vector<16x16x4xf32> to vector<256x4xf32>
    %c6 = arith.constant 6 : index
    %c0_46 = arith.constant 0 : index
    %c0_47 = arith.constant 0 : index
    %46 = vector.load %arg2[%c6, %c0_46, %c0_47] : memref<9x4x8xf32, #tpu.memory_space<vmem>>, vector<1x4x8xf32>
    %47 = vector.shape_cast %46 : vector<1x4x8xf32> to vector<4x8xf32>
    %cst_48 = arith.constant dense<0.000000e+00> : vector<256x8xf32>
    %48 = tpu.matmul %45, %47, %cst_48 {dimension_numbers = #tpu.dot_dimension_numbers<[1], [0], [0], [1], [0, 0, 1, 1], [], []>} : vector<256x4xf32>, vector<4x8xf32>, vector<256x8xf32> -> vector<256x8xf32>
    %49 = arith.addf %42, %48 : vector<256x8xf32>
    %c0_49 = arith.constant 0 : index
    %c2_50 = arith.constant 2 : index
    %c1_51 = arith.constant 1 : index
    %c0_52 = arith.constant 0 : index
    %50 = vector.load %arg1[%c0_49, %c2_50, %c1_51, %c0_52] : memref<1x18x18x4xf32, #tpu.memory_space<vmem>>, vector<1x16x16x4xf32>
    %51 = vector.shape_cast %50 : vector<1x16x16x4xf32> to vector<16x16x4xf32>
    %52 = vector.shape_cast %51 : vector<16x16x4xf32> to vector<256x4xf32>
    %c7 = arith.constant 7 : index
    %c0_53 = arith.constant 0 : index
    %c0_54 = arith.constant 0 : index
    %53 = vector.load %arg2[%c7, %c0_53, %c0_54] : memref<9x4x8xf32, #tpu.memory_space<vmem>>, vector<1x4x8xf32>
    %54 = vector.shape_cast %53 : vector<1x4x8xf32> to vector<4x8xf32>
    %cst_55 = arith.constant dense<0.000000e+00> : vector<256x8xf32>
    %55 = tpu.matmul %52, %54, %cst_55 {dimension_numbers = #tpu.dot_dimension_numbers<[1], [0], [0], [1], [0, 0, 1, 1], [], []>} : vector<256x4xf32>, vector<4x8xf32>, vector<256x8xf32> -> vector<256x8xf32>
    %56 = arith.addf %49, %55 : vector<256x8xf32>
    %c0_56 = arith.constant 0 : index
    %c2_57 = arith.constant 2 : index
    %c2_58 = arith.constant 2 : index
    %c0_59 = arith.constant 0 : index
    %57 = vector.load %arg1[%c0_56, %c2_57, %c2_58, %c0_59] : memref<1x18x18x4xf32, #tpu.memory_space<vmem>>, vector<1x16x16x4xf32>
    %58 = vector.shape_cast %57 : vector<1x16x16x4xf32> to vector<16x16x4xf32>
    %59 = vector.shape_cast %58 : vector<16x16x4xf32> to vector<256x4xf32>
    %c8 = arith.constant 8 : index
    %c0_60 = arith.constant 0 : index
    %c0_61 = arith.constant 0 : index
    %60 = vector.load %arg2[%c8, %c0_60, %c0_61] : memref<9x4x8xf32, #tpu.memory_space<vmem>>, vector<1x4x8xf32>
    %61 = vector.shape_cast %60 : vector<1x4x8xf32> to vector<4x8xf32>
    %cst_62 = arith.constant dense<0.000000e+00> : vector<256x8xf32>
    %62 = tpu.matmul %59, %61, %cst_62 {dimension_numbers = #tpu.dot_dimension_numbers<[1], [0], [0], [1], [0, 0, 1, 1], [], []>} : vector<256x4xf32>, vector<4x8xf32>, vector<256x8xf32> -> vector<256x8xf32>
    %63 = arith.addf %56, %62 : vector<256x8xf32>
    %c0_63 = arith.constant 0 : index
    %c0_64 = arith.constant 0 : index
    %64 = vector.load %arg3[%c0_63, %c0_64] : memref<1x8xf32, #tpu.memory_space<vmem>>, vector<1x8xf32>
    %65 = vector.broadcast %64 : vector<1x8xf32> to vector<256x8xf32>
    %66 = arith.addf %63, %65 : vector<256x8xf32>
    %cst_65 = arith.constant 5.000000e-01 : f32
    %67 = vector.broadcast %cst_65 : f32 to vector<256x8xf32>
    %68 = arith.mulf %67, %66 : vector<256x8xf32>
    %cst_66 = arith.constant 0.707106769 : f32
    %69 = vector.broadcast %cst_66 : f32 to vector<256x8xf32>
    %70 = arith.mulf %66, %69 : vector<256x8xf32>
    %71 = math.erf %70 : vector<256x8xf32>
    %cst_67 = arith.constant 1.000000e+00 : f32
    %72 = vector.broadcast %cst_67 : f32 to vector<256x8xf32>
    %73 = arith.addf %72, %71 : vector<256x8xf32>
    %74 = arith.mulf %68, %73 : vector<256x8xf32>
    %75 = vector.shape_cast %74 : vector<256x8xf32> to vector<1x16x16x8xf32>
    %c0_68 = arith.constant 0 : index
    %c0_69 = arith.constant 0 : index
    %c0_70 = arith.constant 0 : index
    %c0_71 = arith.constant 0 : index
    %76 = vector.load %arg4[%c0_68, %c0_69, %c0_70, %c0_71] : memref<1x16x16x8xf32, #tpu.memory_space<vmem>>, vector<1x16x16x8xf32>
    tpu.vector_store %arg4[%c0_68, %c0_69, %c0_70, %c0_71], %75 {strides = array<i32>} : memref<1x16x16x8xf32, #tpu.memory_space<vmem>>, vector<1x16x16x8xf32>,
    return
  }
  func.func @transform_0(%arg0: i32) -> (i32, i32, i32, i32) {
    %c0_i32 = arith.constant 0 : i32
    %c0_i32_0 = arith.constant 0 : i32
    %c0_i32_1 = arith.constant 0 : i32
    %c0_i32_2 = arith.constant 0 : i32
    return %arg0, %c0_i32, %c0_i32_0, %c0_i32_1 : i32, i32, i32, i32
  }
  func.func @transform_1(%arg0: i32) -> (i32, i32, i32) {
    %c0_i32 = arith.constant 0 : i32
    %c0_i32_0 = arith.constant 0 : i32
    %c0_i32_1 = arith.constant 0 : i32
    %c0_i32_2 = arith.constant 0 : i32
    return %c0_i32, %c0_i32_0, %c0_i32_1 : i32, i32, i32
  }
  func.func @transform_2(%arg0: i32) -> (i32, i32) {
    %c0_i32 = arith.constant 0 : i32
    %c0_i32_0 = arith.constant 0 : i32
    %c0_i32_1 = arith.constant 0 : i32
    return %c0_i32, %c0_i32_0 : i32, i32
  }
  func.func @transform_3(%arg0: i32) -> (i32, i32, i32, i32) {
    %c0_i32 = arith.constant 0 : i32
    %c0_i32_0 = arith.constant 0 : i32
    %c0_i32_1 = arith.constant 0 : i32
    %c0_i32_2 = arith.constant 0 : i32
    return %arg0, %c0_i32, %c0_i32_0, %c0_i32_1 : i32, i32, i32, i32
  }
}

</mosaic_0001>

<bundles_post_ra>
// kernel: tpu_custom_call.1
= control target key start
LH: loop header
LB: loop body
LE: loop exit
PB: predicated region body
PF: predicated region fallthrough
CT: control target
= control target key end

     0   :  { %s5522_s12 = smov 0   ;;  %s6683_s0 = inlined_call_operand.vmem [shape: f32[2,18,18,4], index: 0, kind: input, shape index: {}]   ;;  %s6684_s1 = inlined_call_operand.vmem [shape: f32[9,4,8], index: 1, kind: input, shape index: {}]   ;;  %s6685_s2 = inlined_call_operand.vmem [shape: f32[1,8], index: 2, kind: input, shape index: {}]   ;;  %s6686_s3 = inlined_call_operand.vmem [shape: f32[2,16,16,8], index: 3, kind: output, shape index: {}]  }
   0x1 LB: > { %s3907_s13 = sadd.s32 4294967295, %s5500_s12   ;;  %p3911_p0 = scmp.ge.s32.totalorder %s5500_s12, 1  ;;  %s5500_s12 = sphi %s5522_s12, %s13_s12  }
   0x2   : > { %p137_p1 = scmp.lt.s32.totalorder %s5500_s12, 3 }
   0x4   : > { %p138_p2 = pnand %p3911_p0, %p137_p1 }
   0x6   : > { %141 = sbr.rel (%p138_p2) target bundleno = 540 (0x21c), region = 32 }
   0xd   : > { %v3915_v0 = vld [vmem:[%s6684_s1 + $0x4] sm:$0xf]  ;;  %vm335_vm0 = vcmask 1043456   ;;  %v5536_v1 = vld [vmem:[%s6684_s1 + $0x10] sm:$0xf]  ;;  %p161_p3 = scmp.lt.s32.totalorder %s3907_s13, 1 }
   0xe   : > { %4713 = vmatprep.subr.msk.mxu1 %vm335_vm0, %v3915_v0  ;;  %4913 = vmatprep.subr.msk.mxu0 %vm335_vm0, %v5536_v1  ;;  %v203_v2 = vld [vmem:[%s6684_s1] sm:$0xf]  ;;  %v4180_v3 = vld [vmem:[%s6684_s1 + $0x14] sm:$0xf]  ;;  %vm238_vm1 = vcmask 31744   ;;  %vm3819_vm2 = vcmask 64512  }
   0xf   : > { %4714 = vmatpush3.msk.msra.mxu1 %vm335_vm0, %v3915_v0  ;;  %4914 = vmatpush3.msk.msra.mxu0 %vm335_vm0, %v5536_v1  ;;  %s6797_s13 = smov (!%p161_p3, %s3907_s13), 1  ;;  %v4246_v9 = vld [vmem:[%s6684_s1 + $0x18] sm:$0xf]  ;;  %v5577_v10 = vld [vmem:[%s6684_s1 + $0x8] sm:$0xf] }
  0x10   : > { %4763 = vmatprep.subr.msk.mxu1 %vm335_vm0, %v203_v2  ;;  %4963 = vmatprep.subr.msk.mxu0 %vm335_vm0, %v4180_v3  ;;  %s5421_s22 = smul.u32 432, %s6797_s13  ;;  %v5696_v28 = vld [vmem:[%s6684_s1 + $0x1c] sm:$0xf]  ;;  %v5859_v61 = vld [vmem:[%s6684_s1 + $0xc] sm:$0xf]  ;;  %s4415_s11 = sshll.u32 %s6797_s13, 8 }
  0x11   : > { %s6501_s13 = scalar_lea.vmem %s6686_s3, %s4415_s11 }
  0x12   : > { %s5558_s25 = scalar_lea.vmem %s6683_s0, %s5421_s22 }
  0x13   : > { %v204_v4 = vld [vmem:[%s5558_s25 + $0x1] sm:$0xff]  ;;  %v4082_v5 = vld [vmem:[%s5558_s25 + $0x19] sm:$0xff]  ;;  %v205_v6 = vld [vmem:[%s5558_s25 + $0x9] sm:$0xff] }
  0x14   : > { %4715 = vmatprep.mubr.msk.f32.mxu1 %vm238_vm1, %v204_v4  ;;  %4915 = vmatprep.mubr.msk.f32.mxu0 %vm238_vm1, %v4082_v5  ;;  %v4083_v7 = vld [vmem:[%s5558_s25 + $0x21] sm:$0xff]  ;;  %v5567_v8 = vld [vmem:[%s5558_s25 + $0x31] sm:$0xff]  ;;  %v5582_v11 = vld [vmem:[%s5558_s25 + $0x39] sm:$0xff] }
  0x15   : > { %4716 = vmatmul.mubr.msk.f32.vlgmr.msra.gmra.mrb[0].mxu1 %vm238_vm1, %v205_v6  ;;  %4916 = vmatmul.mubr.msk.f32.vlgmr.msra.gmra.mrb[0].mxu0 %vm238_vm1, %v4083_v7  ;;  %v5588_v12 = vld [vmem:[%s5558_s25 + $0x49] sm:$0xff]  ;;  %v5601_v13 = vld [vmem:[%s5558_s25 + $0x51] sm:$0xff]  ;;  %v5604_v14 = vld [vmem:[%s5558_s25 + $0x61] sm:$0xff] }
  0x16   : > { %4764 = vmatpush3.msk.msra.mxu1 %vm335_vm0, %v203_v2  ;;  %4964 = vmatpush3.msk.msra.mxu0 %vm335_vm0, %v4180_v3  ;;  %v5615_v15 = vld [vmem:[%s5558_s25 + $0x69] sm:$0xff]  ;;  %v5618_v16 = vld [vmem:[%s5558_s25 + $0x79] sm:$0xff]  ;;  %v5629_v17 = vld [vmem:[%s5558_s25 + $0x81] sm:$0xff] }
  0x17   : > { %4718 = vmatprep.mubr.msk.f32.mxu1 %vm238_vm1, %v4082_v5  ;;  %4918 = vmatprep.mubr.msk.f32.mxu0 %vm238_vm1, %v5567_v8  ;;  %v5632_v18 = vld [vmem:[%s5558_s25 + $0x91] sm:$0xff]  ;;  %v5643_v19 = vld [vmem:[%s5558_s25 + $0x99] sm:$0xff]  ;;  %v5646_v20 = vld [vmem:[%s5558_s25 + $0xa9] sm:$0xff] }
  0x18   : > { %5013 = vmatprep.subr.msk.mxu0 %vm335_vm0, %v4246_v9  ;;  %4813 = vmatprep.subr.msk.mxu1 %vm335_vm0, %v5577_v10  ;;  %v5657_v21 = vld [vmem:[%s5558_s25 + $0xb1] sm:$0xff]  ;;  %v5660_v22 = vld [vmem:[%s5558_s25 + $0xc1] sm:$0xff]  ;;  %v5671_v23 = vld [vmem:[%s5558_s25 + $0xc9] sm:$0xff] }
  0x19   : > { %4719 = vmatmul.mubr.msk.f32.gmra.mrb[2].mxu1 %vm238_vm1, %v4083_v7  ;;  %4919 = vmatmul.mubr.msk.f32.gmra.mrb[2].mxu0 %vm238_vm1, %v5582_v11  ;;  %v5674_v24 = vld [vmem:[%s5558_s25 + $0x1a] sm:$0xff]  ;;  %v5685_v25 = vld [vmem:[%s5558_s25 + $0x22] sm:$0xff]  ;;  %v5691_v27 = vld [vmem:[%s5558_s25 + $0x32] sm:$0xff] }
  0x1a   : > { %4721 = vmatprep.mubr.msk.f32.mxu1 %vm238_vm1, %v5567_v8  ;;  %4921 = vmatprep.mubr.msk.f32.mxu0 %vm238_vm1, %v5588_v12  ;;  %v5688_v26 = vld [vmem:[%s5558_s25 + $0xd9] sm:$0xff]  ;;  %v5706_v29 = vld [vmem:[%s5558_s25 + $0xe1] sm:$0xff]  ;;  %v5714_v31 = vld [vmem:[%s5558_s25 + $0xf1] sm:$0xff] }
  0x1b   : > { %6732 = vst [vmem:[#allocation2_spill] sm:$0xff] %v5706_v29  ;;  %v5709_v30 = vld [vmem:[%s5558_s25 + $0x3a] sm:$0xff]  ;;  %6733 = vst [vmem:[#allocation3_spill] sm:$0xff] %v5714_v31  ;;  %v5717_v32 = vld [vmem:[%s5558_s25 + $0x4a] sm:$0xff] }
  0x1c   : > { %v5730_v33 = vld [vmem:[%s5558_s25 + $0xf9] sm:$0xff]  ;;  %v5736_v35 = vld [vmem:[%s5558_s25 + $0x109] sm:$0xff]  ;;  %v5750_v37 = vld [vmem:[%s5558_s25 + $0x111] sm:$0xff] }
  0x1d   : > { %4722 = vmatmul.mubr.msk.f32.gmra.mrb[4].mxu1 %vm238_vm1, %v5582_v11  ;;  %4922 = vmatmul.mubr.msk.f32.gmra.mrb[4].mxu0 %vm238_vm1, %v5601_v13  ;;  %6734 = vst [vmem:[#allocation4_spill] sm:$0xff] %v5730_v33  ;;  %v5733_v34 = vld [vmem:[%s5558_s25 + $0x52] sm:$0xff]  ;;  %6735 = vst [vmem:[#allocation5_spill] sm:$0xff] %v5736_v35  ;;  %v5739_v36 = vld [vmem:[%s5558_s25 + $0x62] sm:$0xff] }
  0x1e   : > { %4724 = vmatprep.mubr.msk.f32.mxu1 %vm238_vm1, %v5588_v12  ;;  %4924 = vmatprep.mubr.msk.f32.mxu0 %vm238_vm1, %v5604_v14  ;;  %6736 = vst [vmem:[#allocation6_spill] sm:$0xff] %v5750_v37  ;;  %v5753_v38 = vld [vmem:[%s5558_s25 + $0x6a] sm:$0xff]  ;;  %v5756_v39 = vld [vmem:[%s5558_s25 + $0x121] sm:$0xff]  ;;  %v5776_v43 = vld [vmem:[%s5558_s25 + $0x139] sm:$0xff] }
  0x1f   : > { %6737 = vst [vmem:[#allocation7_spill] sm:$0xff] %v5756_v39  ;;  %v5759_v40 = vld [vmem:[%s5558_s25 + $0x7a] sm:$0xff]  ;;  %v5770_v41 = vld [vmem:[%s5558_s25 + $0x129] sm:$0xff]  ;;  %6739 = vst [vmem:[#allocation9_spill] sm:$0xff] %v5776_v43 }
  0x20   : > { %6738 = vst [vmem:[#allocation8_spill] sm:$0xff] %v5770_v41  ;;  %v5773_v42 = vld [vmem:[%s5558_s25 + $0x82] sm:$0xff]  ;;  %v5779_v44 = vld [vmem:[%s5558_s25 + $0x92] sm:$0xff]  ;;  %v5793_v46 = vld [vmem:[%s5558_s25 + $0x9a] sm:$0xff] }
  0x21   : > { %4725 = vmatmul.mubr.msk.f32.gmra.mrb[6].mxu1 %vm238_vm1, %v5601_v13  ;;  %4925 = vmatmul.mubr.msk.f32.gmra.mrb[6].mxu0 %vm238_vm1, %v5615_v15  ;;  %v5790_v45 = vld [vmem:[%s5558_s25 + $0x141] sm:$0xff]  ;;  %v5796_v47 = vld [vmem:[%s5558_s25 + $0x151] sm:$0xff]  ;;  %v5810_v49 = vld [vmem:[%s5558_s25 + $0x159] sm:$0xff] }
  0x22   : > { %4727 = vmatprep.mubr.msk.f32.mxu1 %vm238_vm1, %v5604_v14  ;;  %4927 = vmatprep.mubr.msk.f32.mxu0 %vm238_vm1, %v5618_v16  ;;  %6740 = vst [vmem:[#allocation10_spill] sm:$0xff] %v5790_v45  ;;  %6741 = vst [vmem:[#allocation11_spill] sm:$0xff] %v5796_v47  ;;  %v5799_v48 = vld [vmem:[%s5558_s25 + $0xaa] sm:$0xff]  ;;  %v5813_v50 = vld [vmem:[%s5558_s25 + $0xb2] sm:$0xff] }
  0x23   : > { %6742 = vst [vmem:[#allocation12_spill] sm:$0xff] %v5810_v49  ;;  %v5816_v51 = vld [vmem:[%s5558_s25 + $0x169] sm:$0xff]  ;;  %v5830_v53 = vld [vmem:[%s5558_s25 + $0x171] sm:$0xff]  ;;  %v171_v55 = vld [vmem:[%s5558_s25] sm:$0xff] }
  0x24   : > { %6743 = vst [vmem:[#allocation13_spill] sm:$0xff] %v5816_v51  ;;  %v5819_v52 = vld [vmem:[%s5558_s25 + $0xc2] sm:$0xff]  ;;  %6744 = vst [vmem:[#allocation14_spill] sm:$0xff] %v5830_v53  ;;  %v5833_v54 = vld [vmem:[%s5558_s25 + $0xca] sm:$0xff] }
  0x25   : > { %4728 = vmatmul.mubr.msk.f32.gmra.mrb[8].mxu1 %vm238_vm1, %v5615_v15  ;;  %4928 = vmatmul.mubr.msk.f32.gmra.mrb[8].mxu0 %vm238_vm1, %v5629_v17  ;;  %v5837_v56 = vld [vmem:[%s5558_s25 + $0xda] sm:$0xff]  ;;  %v172_v57 = vld [vmem:[%s5558_s25 + $0x8] sm:$0xff]  ;;  %v5854_v60 = vld [vmem:[%s5558_s25 + $0xf2] sm:$0xff] }
  0x26   : > { %4730 = vmatprep.mubr.msk.f32.mxu1 %vm238_vm1, %v5618_v16  ;;  %4930 = vmatprep.mubr.msk.f32.mxu0 %vm238_vm1, %v5632_v18  ;;  %v5848_v58 = vld [vmem:[%s5558_s25 + $0xe2] sm:$0xff]  ;;  %v5851_v59 = vld [vmem:[%s5558_s25 + $0x18] sm:$0xff]  ;;  %v5877_v0 = vld [vmem:[%s5558_s25 + $0x30] sm:$0xff] }
  0x27   : > { %6745 = vst [vmem:[#allocation15_spill] sm:$0xff] %v5851_v59  ;;  %v5869_v62 = vld [vmem:[%s5558_s25 + $0x20] sm:$0xff]  ;;  %6747 = vst [vmem:[#allocation17_spill] sm:$0xff] %v5877_v0  ;;  %v5880_v2 = vld [vmem:[%s5558_s25 + $0x10a] sm:$0xff] }
  0x28   : > { %6746 = vst [vmem:[#allocation16_spill] sm:$0xff] %v5869_v62  ;;  %v5872_v63 = vld [vmem:[%s5558_s25 + $0xfa] sm:$0xff]  ;;  %v5896_v4 = vld [vmem:[%s5558_s25 + $0x112] sm:$0xff]  ;;  %v5899_v5 = vld [vmem:[%s5558_s25 + $0x48] sm:$0xff] }
  0x29   : > { %4731 = vmatmul.mubr.msk.f32.gmra.mrb[10].mxu1 %vm238_vm1, %v5629_v17  ;;  %4931 = vmatmul.mubr.msk.f32.gmra.mrb[10].mxu0 %vm238_vm1, %v5643_v19  ;;  %v5893_v3 = vld [vmem:[%s5558_s25 + $0x38] sm:$0xff]  ;;  %6749 = vst [vmem:[#allocation19_spill] sm:$0xff] %v5899_v5  ;;  %v5902_v6 = vld [vmem:[%s5558_s25 + $0x122] sm:$0xff]  ;;  %v5913_v7 = vld [vmem:[%s5558_s25 + $0x50] sm:$0xff] }
  0x2a   : > { %4733 = vmatprep.mubr.msk.f32.mxu1 %vm238_vm1, %v5632_v18  ;;  %4933 = vmatprep.mubr.msk.f32.mxu0 %vm238_vm1, %v5646_v20  ;;  %6748 = vst [vmem:[#allocation18_spill] sm:$0xff] %v5893_v3  ;;  %6750 = vst [vmem:[#allocation20_spill] sm:$0xff] %v5913_v7 }
  0x2d   : > { %4734 = vmatmul.mubr.msk.f32.gmra.mrb[12].mxu1 %vm238_vm1, %v5643_v19  ;;  %4934 = vmatmul.mubr.msk.f32.gmra.mrb[12].mxu0 %vm238_vm1, %v5657_v21 }
  0x2e   : > { %4736 = vmatprep.mubr.msk.f32.mxu1 %vm238_vm1, %v5646_v20  ;;  %4936 = vmatprep.mubr.msk.f32.mxu0 %vm238_vm1, %v5660_v22 }
  0x31   : > { %4737 = vmatmul.mubr.msk.f32.gmra.mrb[14].mxu1 %vm238_vm1, %v5657_v21  ;;  %4937 = vmatmul.mubr.msk.f32.gmra.mrb[14].mxu0 %vm238_vm1, %v5671_v23 }
  0x32   : > { %4739 = vmatprep.mubr.msk.f32.mxu1 %vm238_vm1, %v5660_v22  ;;  %4965 = vmatprep.mubr.msk.f32.mxu0 %vm238_vm1, %v5674_v24 }
  0x35   : > { %4740 = vmatmul.mubr.msk.f32.gmra.mrb[16].mxu1 %vm238_vm1, %v5671_v23  ;;  %4966 = vmatmul.mubr.msk.f32.vlgmr.msra.gmra.mrb[0].mxu0 %vm238_vm1, %v5685_v25 }
  0x36   : > { %5014 = vmatpush3.msk.msra.mxu0 %vm335_vm0, %v4246_v9  ;;  %4742 = vmatprep.mubr.msk.f32.mxu1 %vm238_vm1, %v5688_v26  ;;  %v5916_v9 = vld [vmem:[%s5558_s25 + $0x12a] sm:$0xff] }
  0x37   : > { %4968 = vmatprep.mubr.msk.f32.mxu0 %vm238_vm1, %v5691_v27  ;;  %5063 = vmatprep.subr.msk.mxu0 %vm335_vm0, %v5696_v28 }
  0x39   : > { %4743 = vmatmul.mubr.msk.f32.gmra.mrb[18].mxu1 %vm238_vm1, %v5706_v29  ;;  %4969 = vmatmul.mubr.msk.f32.gmra.mrb[2].mxu0 %vm238_vm1, %v5709_v30  ;;  %v6013_v29 = vld [vmem:[%s5558_s25 + $0xd8] sm:$0xff] }
  0x3a   : > { %4745 = vmatprep.mubr.msk.f32.mxu1 %vm238_vm1, %v5714_v31  ;;  %4971 = vmatprep.mubr.msk.f32.mxu0 %vm238_vm1, %v5717_v32  ;;  %v5996_v31 = vld [vmem:[%s5558_s25 + $0x18a] sm:$0xff] }
  0x3b   : > { %6761 = vst [vmem:[#allocation31_spill] sm:$0xff] %v5996_v31 }
  0x3d   : > { %4746 = vmatmul.mubr.msk.f32.gmra.mrb[20].mxu1 %vm238_vm1, %v5730_v33  ;;  %4972 = vmatmul.mubr.msk.f32.gmra.mrb[4].mxu0 %vm238_vm1, %v5733_v34  ;;  %v5982_v33 = vld [vmem:[%s5558_s25 + $0x182] sm:$0xff] }
  0x3e   : > { %4748 = vmatprep.mubr.msk.f32.mxu1 %vm238_vm1, %v5736_v35  ;;  %4974 = vmatprep.mubr.msk.f32.mxu0 %vm238_vm1, %v5739_v36  ;;  %v5979_v35 = vld [vmem:[%s5558_s25 + $0xa8] sm:$0xff]  ;;  %6759 = vst [vmem:[#allocation29_spill] sm:$0xff] %v5982_v33 }
  0x3f   : > { %6758 = vst [vmem:[#allocation28_spill] sm:$0xff] %v5979_v35 }
  0x41   : > { %4749 = vmatmul.mubr.msk.f32.gmra.mrb[22].mxu1 %vm238_vm1, %v5750_v37  ;;  %4975 = vmatmul.mubr.msk.f32.gmra.mrb[6].mxu0 %vm238_vm1, %v5753_v38  ;;  %v5976_v37 = vld [vmem:[%s5558_s25 + $0x172] sm:$0xff] }
  0x42   : > { %4751 = vmatprep.mubr.msk.f32.mxu1 %vm238_vm1, %v5756_v39  ;;  %4977 = vmatprep.mubr.msk.f32.mxu0 %vm238_vm1, %v5759_v40  ;;  %v5973_v39 = vld [vmem:[%s5558_s25 + $0x98] sm:$0xff]  ;;  %6757 = vst [vmem:[#allocation27_spill] sm:$0xff] %v5976_v37 }
  0x43   : > { %6756 = vst [vmem:[#allocation26_spill] sm:$0xff] %v5973_v39 }
  0x45   : > { %4752 = vmatmul.mubr.msk.f32.gmra.mrb[24].mxu1 %vm238_vm1, %v5770_v41  ;;  %4978 = vmatmul.mubr.msk.f32.gmra.mrb[8].mxu0 %vm238_vm1, %v5773_v42  ;;  %v5962_v41 = vld [vmem:[%s5558_s25 + $0x16a] sm:$0xff] }
  0x46   : > { %4754 = vmatprep.mubr.msk.f32.mxu1 %vm238_vm1, %v5776_v43  ;;  %4980 = vmatprep.mubr.msk.f32.mxu0 %vm238_vm1, %v5779_v44  ;;  %v5959_v43 = vld [vmem:[%s5558_s25 + $0x90] sm:$0xff] }
  0x47   : > { %6755 = vst [vmem:[#allocation25_spill] sm:$0xff] %v5959_v43 }
  0x49   : > { %4755 = vmatmul.mubr.msk.f32.gmra.mrb[26].mxu1 %vm238_vm1, %v5790_v45  ;;  %4981 = vmatmul.mubr.msk.f32.gmra.mrb[10].mxu0 %vm238_vm1, %v5793_v46  ;;  %v5956_v45 = vld [vmem:[%s5558_s25 + $0x15a] sm:$0xff] }
  0x4a   : > { %4757 = vmatprep.mubr.msk.f32.mxu1 %vm238_vm1, %v5796_v47  ;;  %4983 = vmatprep.mubr.msk.f32.mxu0 %vm238_vm1, %v5799_v48  ;;  %v5953_v47 = vld [vmem:[%s5558_s25 + $0x80] sm:$0xff] }
  0x4b   : > { %6754 = vst [vmem:[#allocation24_spill] sm:$0xff] %v5953_v47 }
  0x4d   : > { %4758 = vmatmul.mubr.msk.f32.gmra.mrb[28].mxu1 %vm238_vm1, %v5810_v49  ;;  %4984 = vmatmul.mubr.msk.f32.gmra.mrb[12].mxu0 %vm238_vm1, %v5813_v50  ;;  %v5942_v49 = vld [vmem:[%s5558_s25 + $0x152] sm:$0xff] }
  0x4e   : > { %4760 = vmatprep.mubr.msk.f32.mxu1 %vm238_vm1, %v5816_v51  ;;  %4986 = vmatprep.mubr.msk.f32.mxu0 %vm238_vm1, %v5819_v52  ;;  %v5939_v51 = vld [vmem:[%s5558_s25 + $0x78] sm:$0xff] }
  0x4f   : > { %6753 = vst [vmem:[#allocation23_spill] sm:$0xff] %v5939_v51 }
  0x51   : > { %4761 = vmatmul.mubr.msk.f32.gmra.mrb[30].mxu1 %vm238_vm1, %v5830_v53  ;;  %4987 = vmatmul.mubr.msk.f32.gmra.mrb[14].mxu0 %vm238_vm1, %v5833_v54  ;;  %v5936_v53 = vld [vmem:[%s5558_s25 + $0x142] sm:$0xff] }
  0x52   : > { %4765 = vmatprep.mubr.msk.f32.mxu1 %vm238_vm1, %v171_v55  ;;  %4989 = vmatprep.mubr.msk.f32.mxu0 %vm238_vm1, %v5837_v56  ;;  %v5922_v55 = vld [vmem:[%s5558_s25 + $0x13a] sm:$0xff] }
  0x55   : > { %4766 = vmatmul.mubr.msk.f32.vlgmr.msra.gmra.mrb[0].mxu1 %vm238_vm1, %v172_v57  ;;  %4990 = vmatmul.mubr.msk.f32.gmra.mrb[16].mxu0 %vm238_vm1, %v5848_v58  ;;  %v5933_v57 = vld [vmem:[%s5558_s25 + $0x68] sm:$0xff] }
  0x56   : > { %4814 = vmatpush3.msk.msra.mxu1 %vm335_vm0, %v5577_v10  ;;  %4768 = vmatprep.mubr.msk.f32.mxu1 %vm238_vm1, %v5851_v59  ;;  %v5919_v10 = vld [vmem:[%s5558_s25 + $0x60] sm:$0xff]  ;;  %6752 = vst [vmem:[#allocation22_spill] sm:$0xff] %v5933_v57 }
  0x57   : > { %4992 = vmatprep.mubr.msk.f32.mxu0 %vm238_vm1, %v5854_v60  ;;  %4863 = vmatprep.subr.msk.mxu1 %vm335_vm0, %v5859_v61  ;;  %6751 = vst [vmem:[#allocation21_spill] sm:$0xff] %v5919_v10  ;;  %v5999_v59 = vld [vmem:[%s5558_s25 + $0xc0] sm:$0xff] }
  0x59   : > { %4769 = vmatmul.mubr.msk.f32.gmra.mrb[2].mxu1 %vm238_vm1, %v5869_v62  ;;  %4993 = vmatmul.mubr.msk.f32.gmra.mrb[18].mxu0 %vm238_vm1, %v5872_v63  ;;  %v5993_v62 = vld [vmem:[%s5558_s25 + $0xb0] sm:$0xff] }
  0x5a   : > { %4771 = vmatprep.mubr.msk.f32.mxu1 %vm238_vm1, %v5877_v0  ;;  %4995 = vmatprep.mubr.msk.f32.mxu0 %vm238_vm1, %v5880_v2  ;;  %6760 = vst [vmem:[#allocation30_spill] sm:$0xff] %v5993_v62 }
  0x5d   : > { %4772 = vmatmul.mubr.msk.f32.gmra.mrb[4].mxu1 %vm238_vm1, %v5893_v3  ;;  %4996 = vmatmul.mubr.msk.f32.gmra.mrb[20].mxu0 %vm238_vm1, %v5896_v4 }
  0x5e   : > { %4774 = vmatprep.mubr.msk.f32.mxu1 %vm238_vm1, %v5899_v5  ;;  %4998 = vmatprep.mubr.msk.f32.mxu0 %vm238_vm1, %v5902_v6 }
  0x61   : > { %4775 = vmatmul.mubr.msk.f32.gmra.mrb[6].mxu1 %vm238_vm1, %v5913_v7  ;;  %4999 = vmatmul.mubr.msk.f32.gmra.mrb[22].mxu0 %vm238_vm1, %v5916_v9 }
  0x62   : > { %4777 = vmatprep.mubr.msk.f32.mxu1 %vm238_vm1, %v5919_v10  ;;  %5001 = vmatprep.mubr.msk.f32.mxu0 %vm238_vm1, %v5922_v55 }
  0x65   : > { %4778 = vmatmul.mubr.msk.f32.gmra.mrb[8].mxu1 %vm238_vm1, %v5933_v57  ;;  %5002 = vmatmul.mubr.msk.f32.gmra.mrb[24].mxu0 %vm238_vm1, %v5936_v53 }
  0x66   : > { %4780 = vmatprep.mubr.msk.f32.mxu1 %vm238_vm1, %v5939_v51  ;;  %5004 = vmatprep.mubr.msk.f32.mxu0 %vm238_vm1, %v5942_v49 }
  0x69   : > { %4781 = vmatmul.mubr.msk.f32.gmra.mrb[10].mxu1 %vm238_vm1, %v5953_v47  ;;  %5005 = vmatmul.mubr.msk.f32.gmra.mrb[26].mxu0 %vm238_vm1, %v5956_v45 }
  0x6a   : > { %4783 = vmatprep.mubr.msk.f32.mxu1 %vm238_vm1, %v5959_v43  ;;  %5007 = vmatprep.mubr.msk.f32.mxu0 %vm238_vm1, %v5962_v41 }
  0x6d   : > { %4784 = vmatmul.mubr.msk.f32.gmra.mrb[12].mxu1 %vm238_vm1, %v5973_v39  ;;  %5008 = vmatmul.mubr.msk.f32.gmra.mrb[28].mxu0 %vm238_vm1, %v5976_v37  ;;  %v6018_v37 = vld [vmem:[%s6684_s1 + $0x20] sm:$0xf] }
  0x6e   : > { %4786 = vmatprep.mubr.msk.f32.mxu1 %vm238_vm1, %v5979_v35  ;;  %5010 = vmatprep.mubr.msk.f32.mxu0 %vm238_vm1, %v5982_v33  ;;  %v6010_v33 = vld [vmem:[%s5558_s25 + $0xc8] sm:$0xff] }
  0x6f   : > { %6762 = vst [vmem:[#allocation32_spill] sm:$0xff] %v6010_v33 }
  0x71   : > { %4787 = vmatmul.mubr.msk.f32.gmra.mrb[14].mxu1 %vm238_vm1, %v5993_v62  ;;  %5011 = vmatmul.mubr.msk.f32.gmra.mrb[30].mxu0 %vm238_vm1, %v5996_v31  ;;  %v6029_v31 = vld [vmem:[%s5558_s25 + $0xe0] sm:$0xff] }
  0x72   : > { %4789 = vmatprep.mubr.msk.f32.mxu1 %vm238_vm1, %v5999_v59  ;;  %5015 = vmatprep.mubr.msk.f32.mxu0 %vm238_vm1, %v5877_v0  ;;  %v6034_v0 = vld [vmem:[%s5558_s25 + $0xf0] sm:$0xff] }
  0x75   : > { %4790 = vmatmul.mubr.msk.f32.gmra.mrb[16].mxu1 %vm238_vm1, %v6010_v33  ;;  %5016 = vmatmul.mubr.msk.f32.vlgmr.msra.gmra.mrb[0].mxu0 %vm238_vm1, %v5893_v3  ;;  %v888_v3 = vld [vmem:[%s5558_s25 + $0x2] sm:$0xff] }
  0x76   : > { %5064 = vmatpush3.msk.msra.mxu0 %vm335_vm0, %v5696_v28  ;;  %4792 = vmatprep.mubr.msk.f32.mxu1 %vm238_vm1, %v6013_v29  ;;  %v6047_v28 = vld [vmem:[%s5558_s25 + $0xf8] sm:$0xff] }
  0x77   : > { %5018 = vmatprep.mubr.msk.f32.mxu0 %vm238_vm1, %v5899_v5  ;;  %5113 = vmatprep.subr.msk.mxu0 %vm335_vm0, %v6018_v37  ;;  %v6050_v5 = vld [vmem:[%s5558_s25 + $0x108] sm:$0xff] }
  0x79   : > { %4793 = vmatmul.mubr.msk.f32.gmra.mrb[18].mxu1 %vm238_vm1, %v6029_v31  ;;  %5019 = vmatmul.mubr.msk.f32.gmra.mrb[2].mxu0 %vm238_vm1, %v5913_v7  ;;  %v6061_v7 = vld [vmem:[%s5558_s25 + $0x110] sm:$0xff] }
  0x7a   : > { %4795 = vmatprep.mubr.msk.f32.mxu1 %vm238_vm1, %v6034_v0  ;;  %5021 = vmatprep.mubr.msk.f32.mxu0 %vm238_vm1, %v5919_v10  ;;  %v6064_v10 = vld [vmem:[%s5558_s25 + $0x120] sm:$0xff] }
  0x7d   : > { %4796 = vmatmul.mubr.msk.f32.gmra.mrb[20].mxu1 %vm238_vm1, %v6047_v28  ;;  %5022 = vmatmul.mubr.msk.f32.gmra.mrb[4].mxu0 %vm238_vm1, %v5933_v57  ;;  %v6075_v57 = vld [vmem:[%s5558_s25 + $0x128] sm:$0xff] }
  0x7e   : > { %4798 = vmatprep.mubr.msk.f32.mxu1 %vm238_vm1, %v6050_v5  ;;  %5024 = vmatprep.mubr.msk.f32.mxu0 %vm238_vm1, %v5939_v51  ;;  %v6078_v51 = vld [vmem:[%s5558_s25 + $0x138] sm:$0xff] }
  0x81   : > { %4799 = vmatmul.mubr.msk.f32.gmra.mrb[22].mxu1 %vm238_vm1, %v6061_v7  ;;  %5025 = vmatmul.mubr.msk.f32.gmra.mrb[6].mxu0 %vm238_vm1, %v5953_v47  ;;  %v6089_v47 = vld [vmem:[%s5558_s25 + $0x140] sm:$0xff] }
  0x82   : > { %4801 = vmatprep.mubr.msk.f32.mxu1 %vm238_vm1, %v6064_v10  ;;  %5027 = vmatprep.mubr.msk.f32.mxu0 %vm238_vm1, %v5959_v43  ;;  %v6092_v43 = vld [vmem:[%s5558_s25 + $0x150] sm:$0xff] }
  0x85   : > { %4802 = vmatmul.mubr.msk.f32.gmra.mrb[24].mxu1 %vm238_vm1, %v6075_v57  ;;  %5028 = vmatmul.mubr.msk.f32.gmra.mrb[8].mxu0 %vm238_vm1, %v5973_v39  ;;  %v6103_v39 = vld [vmem:[%s5558_s25 + $0x158] sm:$0xff] }
  0x86   : > { %4804 = vmatprep.mubr.msk.f32.mxu1 %vm238_vm1, %v6078_v51  ;;  %5030 = vmatprep.mubr.msk.f32.mxu0 %vm238_vm1, %v5979_v35  ;;  %v6106_v35 = vld [vmem:[%s5558_s25 + $0x168] sm:$0xff] }
  0x89   : > { %4805 = vmatmul.mubr.msk.f32.gmra.mrb[26].mxu1 %vm238_vm1, %v6089_v47  ;;  %5031 = vmatmul.mubr.msk.f32.gmra.mrb[10].mxu0 %vm238_vm1, %v5993_v62  ;;  %v6117_v62 = vld [vmem:[%s5558_s25 + $0x170] sm:$0xff] }
  0x8a   : > { %4807 = vmatprep.mubr.msk.f32.mxu1 %vm238_vm1, %v6092_v43  ;;  %5033 = vmatprep.mubr.msk.f32.mxu0 %vm238_vm1, %v5999_v59 }
  0x8d   : > { %4808 = vmatmul.mubr.msk.f32.gmra.mrb[28].mxu1 %vm238_vm1, %v6103_v39  ;;  %5034 = vmatmul.mubr.msk.f32.gmra.mrb[12].mxu0 %vm238_vm1, %v6010_v33  ;;  %v889_v33 = vld [vmem:[%s5558_s25 + $0xa] sm:$0xff] }
  0x8e   : > { %4810 = vmatprep.mubr.msk.f32.mxu1 %vm238_vm1, %v6106_v35  ;;  %5036 = vmatprep.mubr.msk.f32.mxu0 %vm238_vm1, %v6013_v29 }
  0x91   : > { %4811 = vmatmul.mubr.msk.f32.gmra.mrb[30].mxu1 %vm238_vm1, %v6117_v62  ;;  %5037 = vmatmul.mubr.msk.f32.gmra.mrb[14].mxu0 %vm238_vm1, %v6029_v31 }
  0x92   : > { %4815 = vmatprep.mubr.msk.f32.mxu1 %vm238_vm1, %v888_v3  ;;  %5039 = vmatprep.mubr.msk.f32.mxu0 %vm238_vm1, %v6034_v0  ;;  %v6779_v3 = vld [vmem:[#allocation22_spill] sm:$0xff] }
  0x95   : > { %4816 = vmatmul.mubr.msk.f32.vlgmr.msra.gmra.mrb[0].mxu1 %vm238_vm1, %v889_v33  ;;  %5040 = vmatmul.mubr.msk.f32.gmra.mrb[16].mxu0 %vm238_vm1, %v6047_v28  ;;  %v4244_v33 = vld [vmem:[%s5558_s25 + $0x198] sm:$0xff] }
  0x96   : > { %4864 = vmatpush3.msk.msra.mxu1 %vm335_vm0, %v5859_v61  ;;  %4818 = vmatprep.mubr.msk.f32.mxu1 %vm238_vm1, %v5674_v24  ;;  %v6172_v24 = vld [vmem:[%s5558_s25 + $0x180] sm:$0xff] }
  0x97   : > { %5042 = vmatprep.mubr.msk.f32.mxu0 %vm238_vm1, %v6050_v5  ;;  %5163 = vmatprep.subr.msk.mxu1 %vm335_vm0, %v5536_v1  ;;  %v4245_v61 = vld [vmem:[%s5558_s25 + $0x1a0] sm:$0xff] }
  0x99   : > { %4819 = vmatmul.mubr.msk.f32.gmra.mrb[2].mxu1 %vm238_vm1, %v5685_v25  ;;  %5043 = vmatmul.mubr.msk.f32.gmra.mrb[18].mxu0 %vm238_vm1, %v6061_v7  ;;  %v6183_v25 = vld [vmem:[%s5558_s25 + $0x188] sm:$0xff] }
  0x9a   : > { %4821 = vmatprep.mubr.msk.f32.mxu1 %vm238_vm1, %v5691_v27  ;;  %5045 = vmatprep.mubr.msk.f32.mxu0 %vm238_vm1, %v6064_v10 }
  0x9d   : > { %4822 = vmatmul.mubr.msk.f32.gmra.mrb[4].mxu1 %vm238_vm1, %v5709_v30  ;;  %5046 = vmatmul.mubr.msk.f32.gmra.mrb[20].mxu0 %vm238_vm1, %v6075_v57 }
  0x9e   : > { %4824 = vmatprep.mubr.msk.f32.mxu1 %vm238_vm1, %v5717_v32  ;;  %5048 = vmatprep.mubr.msk.f32.mxu0 %vm238_vm1, %v6078_v51 }
  0xa1   : > { %4825 = vmatmul.mubr.msk.f32.gmra.mrb[6].mxu1 %vm238_vm1, %v5733_v34  ;;  %5049 = vmatmul.mubr.msk.f32.gmra.mrb[22].mxu0 %vm238_vm1, %v6089_v47 }
  0xa2   : > { %4827 = vmatprep.mubr.msk.f32.mxu1 %vm238_vm1, %v5739_v36  ;;  %5051 = vmatprep.mubr.msk.f32.mxu0 %vm238_vm1, %v6092_v43 }
  0xa5   : > { %4828 = vmatmul.mubr.msk.f32.gmra.mrb[8].mxu1 %vm238_vm1, %v5753_v38  ;;  %5052 = vmatmul.mubr.msk.f32.gmra.mrb[24].mxu0 %vm238_vm1, %v6103_v39 }
  0xa6   : > { %4830 = vmatprep.mubr.msk.f32.mxu1 %vm238_vm1, %v5759_v40  ;;  %5054 = vmatprep.mubr.msk.f32.mxu0 %vm238_vm1, %v6106_v35 }
  0xa9   : > { %4831 = vmatmul.mubr.msk.f32.gmra.mrb[10].mxu1 %vm238_vm1, %v5773_v42  ;;  %5055 = vmatmul.mubr.msk.f32.gmra.mrb[26].mxu0 %vm238_vm1, %v6117_v62 }
  0xaa   : > { %4833 = vmatprep.mubr.msk.f32.mxu1 %vm238_vm1, %v5779_v44  ;;  %5057 = vmatprep.mubr.msk.f32.mxu0 %vm238_vm1, %v6172_v24 }
  0xad   : > { %4834 = vmatmul.mubr.msk.f32.gmra.mrb[12].mxu1 %vm238_vm1, %v5793_v46  ;;  %5058 = vmatmul.mubr.msk.f32.gmra.mrb[28].mxu0 %vm238_vm1, %v6183_v25 }
  0xae   : > { %4836 = vmatprep.mubr.msk.f32.mxu1 %vm238_vm1, %v5799_v48  ;;  %5060 = vmatprep.mubr.msk.f32.mxu0 %vm238_vm1, %v4244_v33  ;;  %v6780_v33 = vld [vmem:[#allocation10_spill] sm:$0xff] }
  0xb1   : > { %4837 = vmatmul.mubr.msk.f32.gmra.mrb[14].mxu1 %vm238_vm1, %v5813_v50  ;;  %5061 = vmatmul.mubr.msk.f32.gmra.mrb[30].mxu0 %vm238_vm1, %v4245_v61  ;;  %v6781_v61 = vld [vmem:[#allocation23_spill] sm:$0xff] }
  0xb2   : > { %4839 = vmatprep.mubr.msk.f32.mxu1 %vm238_vm1, %v5819_v52  ;;  %5065 = vmatprep.mubr.msk.f32.mxu0 %vm238_vm1, %v5567_v8  ;;  %v6763_v8 = vld [vmem:[#allocation27_spill] sm:$0xff] }
  0xb5   : > { %4840 = vmatmul.mubr.msk.f32.gmra.mrb[16].mxu1 %vm238_vm1, %v5833_v54  ;;  %5066 = vmatmul.mubr.msk.f32.vlgmr.msra.gmra.mrb[0].mxu0 %vm238_vm1, %v5582_v11  ;;  %v6764_v11 = vld [vmem:[#allocation2_spill] sm:$0xff] }
  0xb6   : > { %5114 = vmatpush3.msk.msra.mxu0 %vm335_vm0, %v6018_v37  ;;  %4842 = vmatprep.mubr.msk.f32.mxu1 %vm238_vm1, %v5837_v56  ;;  %v6778_v37 = vld [vmem:[#allocation9_spill] sm:$0xff] }
  0xb7   : > { %5068 = vmatprep.mubr.msk.f32.mxu0 %vm238_vm1, %v5588_v12  ;;  %v6765_v12 = vld [vmem:[#allocation15_spill] sm:$0xff] }
  0xb9   : > { %4843 = vmatmul.mubr.msk.f32.gmra.mrb[18].mxu1 %vm238_vm1, %v5848_v58  ;;  %5069 = vmatmul.mubr.msk.f32.gmra.mrb[2].mxu0 %vm238_vm1, %v5601_v13  ;;  %v6766_v13 = vld [vmem:[#allocation3_spill] sm:$0xff] }
  0xba   : > { %4845 = vmatprep.mubr.msk.f32.mxu1 %vm238_vm1, %v5854_v60  ;;  %5071 = vmatprep.mubr.msk.f32.mxu0 %vm238_vm1, %v5604_v14  ;;  %v6767_v14 = vld [vmem:[#allocation16_spill] sm:$0xff] }
  0xbd   : > { %4846 = vmatmul.mubr.msk.f32.gmra.mrb[20].mxu1 %vm238_vm1, %v5872_v63  ;;  %5072 = vmatmul.mubr.msk.f32.gmra.mrb[4].mxu0 %vm238_vm1, %v5615_v15  ;;  %v6768_v15 = vld [vmem:[#allocation4_spill] sm:$0xff] }
  0xbe   : > { %4848 = vmatprep.mubr.msk.f32.mxu1 %vm238_vm1, %v5880_v2  ;;  %5074 = vmatprep.mubr.msk.f32.mxu0 %vm238_vm1, %v5618_v16  ;;  %v6769_v16 = vld [vmem:[#allocation17_spill] sm:$0xff] }
  0xc1   : > { %4849 = vmatmul.mubr.msk.f32.gmra.mrb[22].mxu1 %vm238_vm1, %v5896_v4  ;;  %5075 = vmatmul.mubr.msk.f32.gmra.mrb[6].mxu0 %vm238_vm1, %v5629_v17  ;;  %v6770_v17 = vld [vmem:[#allocation5_spill] sm:$0xff] }
  0xc2   : > { %4851 = vmatprep.mubr.msk.f32.mxu1 %vm238_vm1, %v5902_v6  ;;  %5077 = vmatprep.mubr.msk.f32.mxu0 %vm238_vm1, %v5632_v18  ;;  %v6771_v18 = vld [vmem:[#allocation18_spill] sm:$0xff] }
  0xc5   : > { %4852 = vmatmul.mubr.msk.f32.gmra.mrb[24].mxu1 %vm238_vm1, %v5916_v9  ;;  %5078 = vmatmul.mubr.msk.f32.gmra.mrb[8].mxu0 %vm238_vm1, %v5643_v19  ;;  %v6772_v19 = vld [vmem:[#allocation6_spill] sm:$0xff] }
  0xc6   : > { %4854 = vmatprep.mubr.msk.f32.mxu1 %vm238_vm1, %v5922_v55  ;;  %5080 = vmatprep.mubr.msk.f32.mxu0 %vm238_vm1, %v5646_v20  ;;  %v6773_v20 = vld [vmem:[#allocation19_spill] sm:$0xff] }
  0xc9   : > { %4855 = vmatmul.mubr.msk.f32.gmra.mrb[26].mxu1 %vm238_vm1, %v5936_v53  ;;  %5081 = vmatmul.mubr.msk.f32.gmra.mrb[10].mxu0 %vm238_vm1, %v5657_v21  ;;  %v6774_v21 = vld [vmem:[#allocation7_spill] sm:$0xff] }
  0xca   : > { %4857 = vmatprep.mubr.msk.f32.mxu1 %vm238_vm1, %v5942_v49  ;;  %5083 = vmatprep.mubr.msk.f32.mxu0 %vm238_vm1, %v5660_v22  ;;  %v6776_v22 = vld [vmem:[#allocation8_spill] sm:$0xff] }
  0xcd   : > { %4858 = vmatmul.mubr.msk.f32.gmra.mrb[28].mxu1 %vm238_vm1, %v5956_v45  ;;  %5084 = vmatmul.mubr.msk.f32.gmra.mrb[12].mxu0 %vm238_vm1, %v5671_v23  ;;  %v6777_v23 = vld [vmem:[#allocation21_spill] sm:$0xff] }
  0xce   : > { %4860 = vmatprep.mubr.msk.f32.mxu1 %vm238_vm1, %v5962_v41  ;;  %5086 = vmatprep.mubr.msk.f32.mxu0 %vm238_vm1, %v5688_v26 }
  0xd1   : > { %4861 = vmatmul.mubr.msk.f32.gmra.mrb[30].mxu1 %vm238_vm1, %v6763_v8  ;;  %5087 = vmatmul.mubr.msk.f32.gmra.mrb[14].mxu0 %vm238_vm1, %v6764_v11  ;;  %v6790_v8 = vld [vmem:[#allocation30_spill] sm:$0xff] }
  0xd2   : > { %4865 = vmatprep.mubr.msk.f32.mxu1 %vm238_vm1, %v6765_v12  ;;  %5089 = vmatprep.mubr.msk.f32.mxu0 %vm238_vm1, %v6766_v13  ;;  %v6782_v12 = vld [vmem:[#allocation11_spill] sm:$0xff] }
  0xd5   : > { %4866 = vmatmul.mubr.msk.f32.vlgmr.msra.gmra.mrb[0].mxu1 %vm238_vm1, %v6767_v14  ;;  %5090 = vmatmul.mubr.msk.f32.gmra.mrb[16].mxu0 %vm238_vm1, %v6768_v15  ;;  %v6783_v14 = vld [vmem:[#allocation24_spill] sm:$0xff] }
  0xd6   : > { %5164 = vmatpush3.msk.msra.mxu1 %vm335_vm0, %v5536_v1  ;;  %4868 = vmatprep.mubr.msk.f32.mxu1 %vm238_vm1, %v6769_v16  ;;  %v6775_v1 = vld [vmem:[#allocation20_spill] sm:$0xff] }
  0xd7   : > { %5092 = vmatprep.mubr.msk.f32.mxu0 %vm238_vm1, %v6770_v17  ;;  %v6784_v16 = vld [vmem:[#allocation12_spill] sm:$0xff] }
  0xd9   : > { %4869 = vmatmul.mubr.msk.f32.gmra.mrb[2].mxu1 %vm238_vm1, %v6771_v18  ;;  %5093 = vmatmul.mubr.msk.f32.gmra.mrb[18].mxu0 %vm238_vm1, %v6772_v19  ;;  %v6785_v18 = vld [vmem:[#allocation25_spill] sm:$0xff] }
  0xda   : > { %4871 = vmatprep.mubr.msk.f32.mxu1 %vm238_vm1, %v6773_v20  ;;  %5095 = vmatprep.mubr.msk.f32.mxu0 %vm238_vm1, %v6774_v21  ;;  %v6786_v20 = vld [vmem:[#allocation13_spill] sm:$0xff] }
  0xdd   : > { %4872 = vmatmul.mubr.msk.f32.gmra.mrb[4].mxu1 %vm238_vm1, %v6775_v1  ;;  %5096 = vmatmul.mubr.msk.f32.gmra.mrb[20].mxu0 %vm238_vm1, %v6776_v22  ;;  %v6310_v1 = vld [vmem:[%s5558_s25 + $0x181] sm:$0xff] }
  0xde   : > { %4874 = vmatprep.mubr.msk.f32.mxu1 %vm238_vm1, %v6777_v23  ;;  %5098 = vmatprep.mubr.msk.f32.mxu0 %vm238_vm1, %v6778_v37  ;;  %v6787_v23 = vld [vmem:[#allocation26_spill] sm:$0xff] }
  0xe1   : > { %4875 = vmatmul.mubr.msk.f32.gmra.mrb[6].mxu1 %vm238_vm1, %v6779_v3  ;;  %5099 = vmatmul.mubr.msk.f32.gmra.mrb[22].mxu0 %vm238_vm1, %v6780_v33  ;;  %v6788_v3 = vld [vmem:[#allocation14_spill] sm:$0xff] }
  0xe2   : > { %4877 = vmatprep.mubr.msk.f32.mxu1 %vm238_vm1, %v6781_v61  ;;  %5101 = vmatprep.mubr.msk.f32.mxu0 %vm238_vm1, %v6782_v12  ;;  %v6789_v61 = vld [vmem:[#allocation28_spill] sm:$0xff] }
  0xe5   : > { %4878 = vmatmul.mubr.msk.f32.gmra.mrb[8].mxu1 %vm238_vm1, %v6783_v14  ;;  %5102 = vmatmul.mubr.msk.f32.gmra.mrb[24].mxu0 %vm238_vm1, %v6784_v16  ;;  %v6321_v14 = vld [vmem:[%s5558_s25 + $0x189] sm:$0xff] }
  0xe6   : > { %4880 = vmatprep.mubr.msk.f32.mxu1 %vm238_vm1, %v6785_v18  ;;  %5104 = vmatprep.mubr.msk.f32.mxu0 %vm238_vm1, %v6786_v20  ;;  %v4310_v18 = vld [vmem:[%s5558_s25 + $0x199] sm:$0xff] }
  0xe9   : > { %4881 = vmatmul.mubr.msk.f32.gmra.mrb[10].mxu1 %vm238_vm1, %v6787_v23  ;;  %5105 = vmatmul.mubr.msk.f32.gmra.mrb[26].mxu0 %vm238_vm1, %v6788_v3  ;;  %v4311_v23 = vld [vmem:[%s5558_s25 + $0x1a1] sm:$0xff]  ;;  %v6791_v3 = vld [vmem:[#allocation32_spill] sm:$0xff] }
  0xea   : > { %4883 = vmatprep.mubr.msk.f32.mxu1 %vm238_vm1, %v6789_v61  ;;  %5107 = vmatprep.mubr.msk.f32.mxu0 %vm238_vm1, %v6310_v1 }
  0xed   : > { %4884 = vmatmul.mubr.msk.f32.gmra.mrb[12].mxu1 %vm238_vm1, %v6790_v8  ;;  %5108 = vmatmul.mubr.msk.f32.gmra.mrb[28].mxu0 %vm238_vm1, %v6321_v14 }
  0xee   : > { %4886 = vmatprep.mubr.msk.f32.mxu1 %vm238_vm1, %v5999_v59  ;;  %5110 = vmatprep.mubr.msk.f32.mxu0 %vm238_vm1, %v4310_v18 }
  0xf1   : > { %4887 = vmatmul.mubr.msk.f32.gmra.mrb[14].mxu1 %vm238_vm1, %v6791_v3  ;;  %5111 = vmatmul.mubr.msk.f32.gmra.mrb[30].mxu0 %vm238_vm1, %v4311_v23 }
  0xf2   : > { %4889 = vmatprep.mubr.msk.f32.mxu1 %vm238_vm1, %v6013_v29  ;;  %5115 = vmatprep.mubr.msk.f32.mxu0 %vm238_vm1, %v5691_v27  ;;  %v6793_v27 = vld [vmem:[#allocation29_spill] sm:$0xff] }
  0xf3   : > { %v4376_v29 = vld [vmem:[%s5558_s25 + $0x19a] sm:$0xff] }
  0xf5   : > { %4890 = vmatmul.mubr.msk.f32.gmra.mrb[16].mxu1 %vm238_vm1, %v6029_v31  ;;  %5116 = vmatmul.mubr.msk.f32.vlgmr.msra.gmra.mrb[0].mxu0 %vm238_vm1, %v5709_v30  ;;  %v6794_v30 = vld [vmem:[#allocation14_spill] sm:$0xff]  ;;  %v6795_v31 = vld [vmem:[#allocation31_spill] sm:$0xff] }
  0xf6   : > { %4892 = vmatprep.mubr.msk.f32.mxu1 %vm238_vm1, %v6034_v0  ;;  %5118 = vmatprep.mubr.msk.f32.mxu0 %vm238_vm1, %v5717_v32  ;;  %v4377_v32 = vld [vmem:[%s5558_s25 + $0x1a2] sm:$0xff] }
  0xf9   : > { %4893 = vmatmul.mubr.msk.f32.gmra.mrb[18].mxu1 %vm238_vm1, %v6047_v28  ;;  %5119 = vmatmul.mubr.msk.f32.gmra.mrb[2].mxu0 %vm238_vm1, %v5733_v34 }
  0xfa   : > { %4895 = vmatprep.mubr.msk.f32.mxu1 %vm238_vm1, %v6050_v5  ;;  %5121 = vmatprep.mubr.msk.f32.mxu0 %vm238_vm1, %v5739_v36 }
  0xfd   : > { %4896 = vmatmul.mubr.msk.f32.gmra.mrb[20].mxu1 %vm238_vm1, %v6061_v7  ;;  %5122 = vmatmul.mubr.msk.f32.gmra.mrb[4].mxu0 %vm238_vm1, %v5753_v38 }
  0xfe   : > { %4898 = vmatprep.mubr.msk.f32.mxu1 %vm238_vm1, %v6064_v10  ;;  %5124 = vmatprep.mubr.msk.f32.mxu0 %vm238_vm1, %v5759_v40 }
 0x101   : > { %4899 = vmatmul.mubr.msk.f32.gmra.mrb[22].mxu1 %vm238_vm1, %v6075_v57  ;;  %5125 = vmatmul.mubr.msk.f32.gmra.mrb[6].mxu0 %vm238_vm1, %v5773_v42 }
 0x102   : > { %4901 = vmatprep.mubr.msk.f32.mxu1 %vm238_vm1, %v6078_v51  ;;  %5127 = vmatprep.mubr.msk.f32.mxu0 %vm238_vm1, %v5779_v44 }
 0x105   : > { %4902 = vmatmul.mubr.msk.f32.gmra.mrb[24].mxu1 %vm238_vm1, %v6089_v47  ;;  %5128 = vmatmul.mubr.msk.f32.gmra.mrb[8].mxu0 %vm238_vm1, %v5793_v46 }
 0x106   : > { %4904 = vmatprep.mubr.msk.f32.mxu1 %vm238_vm1, %v6092_v43  ;;  %5130 = vmatprep.mubr.msk.f32.mxu0 %vm238_vm1, %v5799_v48 }
 0x109   : > { %4905 = vmatmul.mubr.msk.f32.gmra.mrb[26].mxu1 %vm238_vm1, %v6103_v39  ;;  %5131 = vmatmul.mubr.msk.f32.gmra.mrb[10].mxu0 %vm238_vm1, %v5813_v50 }
 0x10a   : > { %4907 = vmatprep.mubr.msk.f32.mxu1 %vm238_vm1, %v6106_v35  ;;  %5133 = vmatprep.mubr.msk.f32.mxu0 %vm238_vm1, %v5819_v52  ;;  %v6478_v52 = vld [vmem:[%s6685_s2] ss:$0 sm:$0xff] }
 0x10d   : > { %4908 = vmatmul.mubr.msk.f32.gmra.mrb[28].mxu1 %vm238_vm1, %v6117_v62  ;;  %5134 = vmatmul.mubr.msk.f32.gmra.mrb[12].mxu0 %vm238_vm1, %v5833_v54 }
 0x10e   : > { %4910 = vmatprep.mubr.msk.f32.mxu1 %vm238_vm1, %v6172_v24  ;;  %5136 = vmatprep.mubr.msk.f32.mxu0 %vm238_vm1, %v5837_v56 }
 0x111   : > { %4911 = vmatmul.mubr.msk.f32.gmra.mrb[30].mxu1 %vm238_vm1, %v6183_v25  ;;  %5137 = vmatmul.mubr.msk.f32.gmra.mrb[14].mxu0 %vm238_vm1, %v5848_v58 }
 0x112   : > { %4939 = vmatprep.mubr.msk.f32.mxu1 %vm238_vm1, %v5688_v26  ;;  %5139 = vmatprep.mubr.msk.f32.mxu0 %vm238_vm1, %v5854_v60  ;;  %v6792_v26 = vld [vmem:[#allocation27_spill] sm:$0xff] }
 0x115   : > { %4940 = vmatmul.mubr.msk.f32.vlgmr.msra.gmra.mrb[16].mxu1 %vm238_vm1, %v6764_v11  ;;  %5140 = vmatmul.mubr.msk.f32.gmra.mrb[16].mxu0 %vm238_vm1, %v5872_v63 }
 0x116   : > { %4942 = vmatprep.mubr.msk.f32.mxu1 %vm238_vm1, %v6766_v13  ;;  %5142 = vmatprep.mubr.msk.f32.mxu0 %vm238_vm1, %v5880_v2 }
 0x119   : > { %4943 = vmatmul.mubr.msk.f32.gmra.mrb[18].mxu1 %vm238_vm1, %v6768_v15  ;;  %5143 = vmatmul.mubr.msk.f32.gmra.mrb[18].mxu0 %vm238_vm1, %v5896_v4 }
 0x11a   : > { %4945 = vmatprep.mubr.msk.f32.mxu1 %vm238_vm1, %v6770_v17  ;;  %5145 = vmatprep.mubr.msk.f32.mxu0 %vm238_vm1, %v5902_v6 }
 0x11d   : > { %4946 = vmatmul.mubr.msk.f32.gmra.mrb[20].mxu1 %vm238_vm1, %v6772_v19  ;;  %5146 = vmatmul.mubr.msk.f32.gmra.mrb[20].mxu0 %vm238_vm1, %v5916_v9 }
 0x11e   : > { %4948 = vmatprep.mubr.msk.f32.mxu1 %vm238_vm1, %v6774_v21  ;;  %5148 = vmatprep.mubr.msk.f32.mxu0 %vm238_vm1, %v5922_v55 }
 0x121   : > { %4949 = vmatmul.mubr.msk.f32.gmra.mrb[22].mxu1 %vm238_vm1, %v6776_v22  ;;  %5149 = vmatmul.mubr.msk.f32.gmra.mrb[22].mxu0 %vm238_vm1, %v5936_v53 }
 0x122   : > { %4951 = vmatprep.mubr.msk.f32.mxu1 %vm238_vm1, %v6778_v37  ;;  %5151 = vmatprep.mubr.msk.f32.mxu0 %vm238_vm1, %v5942_v49 }
 0x125   : > { %4952 = vmatmul.mubr.msk.f32.gmra.mrb[24].mxu1 %vm238_vm1, %v6780_v33  ;;  %5152 = vmatmul.mubr.msk.f32.gmra.mrb[24].mxu0 %vm238_vm1, %v5956_v45 }
 0x126   : > { %4954 = vmatprep.mubr.msk.f32.mxu1 %vm238_vm1, %v6782_v12  ;;  %5154 = vmatprep.mubr.msk.f32.mxu0 %vm238_vm1, %v5962_v41 }
 0x129   : > { %4955 = vmatmul.mubr.msk.f32.gmra.mrb[26].mxu1 %vm238_vm1, %v6784_v16  ;;  %5155 = vmatmul.mubr.msk.f32.gmra.mrb[26].mxu0 %vm238_vm1, %v6792_v26 }
 0x12a   : > { %4957 = vmatprep.mubr.msk.f32.mxu1 %vm238_vm1, %v6786_v20  ;;  %5157 = vmatprep.mubr.msk.f32.mxu0 %vm238_vm1, %v6793_v27 }
 0x12d   : > { %4958 = vmatmul.mubr.msk.f32.gmra.mrb[28].mxu1 %vm238_vm1, %v6794_v30  ;;  %5158 = vmatmul.mubr.msk.f32.gmra.mrb[28].mxu0 %vm238_vm1, %v6795_v31 }
 0x12e   : > { %4960 = vmatprep.mubr.msk.f32.mxu1 %vm238_vm1, %v6310_v1  ;;  %5160 = vmatprep.mubr.msk.f32.mxu0 %vm238_vm1, %v4376_v29 }
 0x131   : > { %4961 = vmatmul.mubr.msk.f32.gmra.mrb[30].mxu1 %vm238_vm1, %v6321_v14  ;;  %5161 = vmatmul.mubr.msk.f32.gmra.mrb[30].mxu0 %vm238_vm1, %v4377_v32 }
 0x1a8   : > { %v4867_v34 = vpop.f32.mrb[0].mxu1 }
 0x1a9   : > { %v1478_v35 = vpop.f32.mrb[1].mxu1 }
 0x1ac   : > { %v4870_v36 = vpop.f32.mrb[2].mxu1 }
 0x1ad   : > { %v1488_v38 = vpop.f32.mrb[3].mxu1 }
 0x1b0   : > { %v4873_v39 = vpop.f32.mrb[4].mxu1 }
 0x1b1   : > { %v1498_v40 = vpop.f32.mrb[5].mxu1 }
 0x1b4   : > { %v4876_v41 = vpop.f32.mrb[6].mxu1 }
 0x1b5   : > { %v1508_v42 = vpop.f32.mrb[7].mxu1 }
 0x1b8   : > { %v4879_v43 = vpop.f32.mrb[8].mxu1 }
 0x1b9   : > { %v1518_v44 = vpop.f32.mrb[9].mxu1 }
 0x1bc   : > { %v6463_v45 = vpop.f32.mrb[10].mxu1 }
 0x1bd   : > { %v6465_v46 = vpop.f32.mrb[11].mxu1 }
 0x1c0   : > { %v6467_v47 = vpop.f32.mrb[12].mxu1 }
 0x1c1   : > { %v6469_v48 = vpop.f32.mrb[13].mxu1 }
 0x1c4   : > { %v6471_v49 = vpop.f32.mrb[14].mxu1 }
 0x1c5   : > { %v6473_v50 = vpop.f32.mrb[15].mxu1 }
 0x1c8   : > { %v5117_v51 = vpop.f32.mrb[0].mxu0 }
 0x1c9   : > { %v5165_v53 = vadd.f32 %v5117_v51, %v4867_v34  ;;  %v3429_v54 = vpop.f32.mrb[1].mxu0 }
 0x1ca   : > { %v5166_v56 = vadd.f32 %v3429_v54, %v1478_v35 }
 0x1cb   : > { %v3628_v58 = vadd.f32 %v5165_v53, %v6478_v52 }
 0x1cc   : > { %v3627_v59 = vadd.f32 %v5166_v56, %v6478_v52  ;;  %v5120_v60 = vpop.f32.mrb[2].mxu0 }
 0x1cd   : > { %v3692_v62 = vmul.f32 0.70710677, %v3628_v58  ;;  %v5167_v63 = vadd.f32 %v5120_v60, %v4870_v36  ;;  %v3439_v0 = vpop.f32.mrb[3].mxu0  ;;  %v3660_v3 = vmul.f32 0.5, %v3628_v58 }
 0x1ce   : > { %v3691_v2 = vmul.f32 0.70710677, %v3627_v59  ;;  %v5168_v4 = vadd.f32 %v3439_v0, %v1488_v38  ;;  %v3659_v23 = vmul.f32 0.5, %v3627_v59 }
 0x1cf   : > { %5430 = verf.f32 %v3692_v62  ;;  %v3630_v5 = vadd.f32 %v5167_v63, %v6478_v52 }
 0x1d0   : > { %5432 = verf.f32 %v3691_v2  ;;  %v3629_v6 = vadd.f32 %v5168_v4, %v6478_v52  ;;  %v5123_v7 = vpop.f32.mrb[4].mxu0 }
 0x1d1   : > { %v3694_v9 = vmul.f32 0.70710677, %v3630_v5  ;;  %v5169_v10 = vadd.f32 %v5123_v7, %v4873_v39  ;;  %v3449_v55 = vpop.f32.mrb[5].mxu0 }
 0x1d2   : > { %v3693_v57 = vmul.f32 0.70710677, %v3629_v6  ;;  %v5170_v28 = vadd.f32 %v3449_v55, %v1498_v40  ;;  %v3662_v40 = vmul.f32 0.5, %v3630_v5 }
 0x1d3   : > { %5434 = verf.f32 %v3694_v9  ;;  %v3632_v24 = vadd.f32 %v5169_v10, %v6478_v52 }
 0x1d4   : > { %5436 = verf.f32 %v3693_v57  ;;  %v6486_v25 = vadd.f32 %v5170_v28, %v6478_v52  ;;  %v5126_v8 = vpop.f32.mrb[6].mxu0 }
 0x1d5   : > { %v3696_v11 = vmul.f32 0.70710677, %v3632_v24  ;;  %v5171_v13 = vadd.f32 %v5126_v8, %v4876_v41  ;;  %v3459_v15 = vpop.f32.mrb[7].mxu0  ;;  %v3664_v0 = vmul.f32 0.5, %v3632_v24 }
 0x1d6   : > { %v3695_v17 = vmul.f32 0.70710677, %v6486_v25  ;;  %v5172_v19 = vadd.f32 %v3459_v15, %v1508_v42 }
 0x1d7   : > { %5438 = verf.f32 %v3696_v11  ;;  %v6490_v21 = vadd.f32 %v5171_v13, %v6478_v52 }
 0x1d8   : > { %5440 = verf.f32 %v3695_v17  ;;  %v6494_v22 = vadd.f32 %v5172_v19, %v6478_v52  ;;  %v5129_v37 = vpop.f32.mrb[8].mxu0 }
 0x1d9   : > { %v5431_v33 = vpop.eup %5430  ;;  %v3698_v12 = vmul.f32 0.70710677, %v6490_v21  ;;  %v5173_v16 = vadd.f32 %v5129_v37, %v4879_v43  ;;  %v3469_v20 = vpop.f32.mrb[9].mxu0  ;;  %v3666_v11 = vmul.f32 0.5, %v6490_v21 }
 0x1da   : > { %v5433_v1 = vpop.eup %5432  ;;  %v3756_v61 = vadd.f32 1.0, %v5431_v33  ;;  %v3697_v14 = vmul.f32 0.70710677, %v6494_v22  ;;  %v5174_v18 = vadd.f32 %v3469_v20, %v1518_v44  ;;  %v3661_v44 = vmul.f32 0.5, %v3629_v6 }
 0x1db   : > { %v3755_v26 = vadd.f32 1.0, %v5433_v1  ;;  %5442 = verf.f32 %v3698_v12  ;;  %v6504_v27 = vadd.f32 %v5173_v16, %v6478_v52  ;;  %v3663_v6 = vmul.f32 0.5, %v6486_v25 }
 0x1dc   : > { %v3788_v29 = vmul.f32 %v3756_v61, %v3660_v3  ;;  %5444 = verf.f32 %v3697_v14  ;;  %v6507_v30 = vadd.f32 %v5174_v18, %v6478_v52  ;;  %v5132_v31 = vpop.f32.mrb[10].mxu0  ;;  %v3665_v19 = vmul.f32 0.5, %v6494_v22 }
 0x1dd   : > { %v5435_v32 = vpop.eup %5434  ;;  %v3787_v34 = vmul.f32 %v3755_v26, %v3659_v23  ;;  %v3700_v35 = vmul.f32 0.70710677, %v6504_v27  ;;  %v5175_v36 = vadd.f32 %v5132_v31, %v6463_v45  ;;  %v3479_v38 = vpop.f32.mrb[11].mxu0  ;;  %v3668_v18 = vmul.f32 0.5, %v6504_v27 }
 0x1de   : > { %v5437_v39 = vpop.eup %5436  ;;  %3821 = vst.msk [vmem:[%s6501_s13 + $0x8] sm:$0xff] %vm3819_vm2, %v3788_v29  ;;  %v3758_v41 = vadd.f32 1.0, %v5435_v32  ;;  %v3699_v42 = vmul.f32 0.70710677, %v6507_v30  ;;  %v5176_v43 = vadd.f32 %v3479_v38, %v6465_v46  ;;  %v3667_v31 = vmul.f32 0.5, %v6507_v30 }
 0x1df   : > { %3820 = vst.msk [vmem:[%s6501_s13] sm:$0xff] %vm3819_vm2, %v3787_v34  ;;  %v3757_v51 = vadd.f32 1.0, %v5437_v39  ;;  %5446 = verf.f32 %v3700_v35  ;;  %v6518_v53 = vadd.f32 %v5175_v36, %v6478_v52 }
 0x1e0   : > { %v3790_v45 = vmul.f32 %v3758_v41, %v3662_v40  ;;  %5448 = verf.f32 %v3699_v42  ;;  %v6521_v54 = vadd.f32 %v5176_v43, %v6478_v52  ;;  %v5135_v56 = vpop.f32.mrb[12].mxu0 }
 0x1e1   : > { %v5439_v58 = vpop.eup %5438  ;;  %v3789_v59 = vmul.f32 %v3757_v51, %v3661_v44  ;;  %v3702_v46 = vmul.f32 0.70710677, %v6518_v53  ;;  %v5177_v60 = vadd.f32 %v5135_v56, %v6467_v47  ;;  %v3489_v62 = vpop.f32.mrb[13].mxu0  ;;  %v3670_v51 = vmul.f32 0.5, %v6518_v53 }
 0x1e2   : > { %v5441_v63 = vpop.eup %5440  ;;  %3823 = vst.msk [vmem:[%s6501_s13 + $0x18] sm:$0xff] %vm3819_vm2, %v3790_v45  ;;  %v3760_v2 = vadd.f32 1.0, %v5439_v58  ;;  %v3701_v4 = vmul.f32 0.70710677, %v6521_v54  ;;  %v5178_v5 = vadd.f32 %v3489_v62, %v6469_v48 }
 0x1e3   : > { %3822 = vst.msk [vmem:[%s6501_s13 + $0x10] sm:$0xff] %vm3819_vm2, %v3789_v59  ;;  %v3759_v7 = vadd.f32 1.0, %v5441_v63  ;;  %5450 = verf.f32 %v3702_v46  ;;  %v6533_v9 = vadd.f32 %v5177_v60, %v6478_v52  ;;  %v3669_v59 = vmul.f32 0.5, %v6521_v54 }
 0x1e4   : > { %v3792_v47 = vmul.f32 %v3760_v2, %v3664_v0  ;;  %5452 = verf.f32 %v3701_v4  ;;  %v6536_v10 = vadd.f32 %v5178_v5, %v6478_v52  ;;  %v5138_v55 = vpop.f32.mrb[14].mxu0 }
 0x1e5   : > { %v5443_v57 = vpop.eup %5442  ;;  %v3791_v28 = vmul.f32 %v3759_v7, %v3663_v6  ;;  %v3704_v48 = vmul.f32 0.70710677, %v6533_v9  ;;  %v5179_v24 = vadd.f32 %v5138_v55, %v6471_v49  ;;  %v3499_v8 = vpop.f32.mrb[15].mxu0  ;;  %v3672_v55 = vmul.f32 0.5, %v6533_v9 }
 0x1e6   : > { %v5445_v25 = vpop.eup %5444  ;;  %3825 = vst.msk [vmem:[%s6501_s13 + $0x28] sm:$0xff] %vm3819_vm2, %v3792_v47  ;;  %v3762_v13 = vadd.f32 1.0, %v5443_v57  ;;  %v3703_v15 = vmul.f32 0.70710677, %v6536_v10  ;;  %v5180_v17 = vadd.f32 %v3499_v8, %v6473_v50 }
 0x1e7   : > { %3824 = vst.msk [vmem:[%s6501_s13 + $0x20] sm:$0xff] %vm3819_vm2, %v3791_v28  ;;  %v3761_v37 = vadd.f32 1.0, %v5445_v25  ;;  %5454 = verf.f32 %v3704_v48  ;;  %v6549_v49 = vadd.f32 %v5179_v24, %v6478_v52  ;;  %v3671_v24 = vmul.f32 0.5, %v6536_v10 }
 0x1e8   : > { %v3794_v33 = vmul.f32 %v3762_v13, %v3666_v11  ;;  %5456 = verf.f32 %v3703_v15  ;;  %v6552_v21 = vadd.f32 %v5180_v17, %v6478_v52  ;;  %v4941_v12 = vpop.f32.mrb[16].mxu1  ;;  %v5141_v16 = vpop.f32.mrb[16].mxu0 }
 0x1e9   : > { %v5447_v20 = vpop.eup %5446  ;;  %v3793_v50 = vmul.f32 %v3761_v37, %v3665_v19  ;;  %v3706_v1 = vmul.f32 0.70710677, %v6549_v49  ;;  %v5181_v3 = vadd.f32 %v5141_v16, %v4941_v12  ;;  %v1948_v22 = vpop.f32.mrb[17].mxu1 }
 0x1ea   : > { %v3509_v61 = vpop.f32.mrb[17].mxu0  ;;  %v5449_v14 = vpop.eup %5448  ;;  %3827 = vst.msk [vmem:[%s6501_s13 + $0x38] sm:$0xff] %vm3819_vm2, %v3794_v33  ;;  %v3764_v23 = vadd.f32 1.0, %v5447_v20  ;;  %v3705_v26 = vmul.f32 0.70710677, %v6552_v21  ;;  %v3674_v20 = vmul.f32 0.5, %v6549_v49 }
 0x1eb   : > { %v5182_v29 = vadd.f32 %v3509_v61, %v1948_v22  ;;  %3826 = vst.msk [vmem:[%s6501_s13 + $0x30] sm:$0xff] %vm3819_vm2, %v3793_v50  ;;  %v3763_v32 = vadd.f32 1.0, %v5449_v14  ;;  %5458 = verf.f32 %v3706_v1  ;;  %v6563_v34 = vadd.f32 %v5181_v3, %v6478_v52 }
 0x1ec   : > { %v3796_v35 = vmul.f32 %v3764_v23, %v3668_v18  ;;  %5460 = verf.f32 %v3705_v26  ;;  %v4944_v27 = vpop.f32.mrb[18].mxu1  ;;  %v5144_v38 = vpop.f32.mrb[18].mxu0  ;;  %v3673_v22 = vmul.f32 0.5, %v6552_v21 }
 0x1ed   : > { %v6566_v36 = vadd.f32 %v5182_v29, %v6478_v52  ;;  %v5451_v39 = vpop.eup %5450  ;;  %v3795_v40 = vmul.f32 %v3763_v32, %v3667_v31  ;;  %v3708_v41 = vmul.f32 0.70710677, %v6563_v34  ;;  %v5183_v42 = vadd.f32 %v5144_v38, %v4944_v27  ;;  %v1958_v30 = vpop.f32.mrb[19].mxu1 }
 0x1ee   : > { %v3519_v43 = vpop.f32.mrb[19].mxu0  ;;  %v5453_v44 = vpop.eup %5452  ;;  %3829 = vst.msk [vmem:[%s6501_s13 + $0x48] sm:$0xff] %vm3819_vm2, %v3796_v35  ;;  %v3766_v45 = vadd.f32 1.0, %v5451_v39  ;;  %v3676_v39 = vmul.f32 0.5, %v6563_v34 }
 0x1ef   : > { %v3707_v56 = vmul.f32 0.70710677, %v6566_v36  ;;  %v5184_v58 = vadd.f32 %v3519_v43, %v1958_v30  ;;  %3828 = vst.msk [vmem:[%s6501_s13 + $0x40] sm:$0xff] %vm3819_vm2, %v3795_v40  ;;  %v3765_v46 = vadd.f32 1.0, %v5453_v44  ;;  %5462 = verf.f32 %v3708_v41 }
 0x1f0   : > { %v6577_v60 = vadd.f32 %v5183_v42, %v6478_v52  ;;  %v3798_v62 = vmul.f32 %v3766_v45, %v3670_v51  ;;  %v4947_v53 = vpop.f32.mrb[20].mxu1  ;;  %v5147_v0 = vpop.f32.mrb[20].mxu0  ;;  %v3675_v30 = vmul.f32 0.5, %v6566_v36 }
 0x1f1   : > { %5464 = verf.f32 %v3707_v56  ;;  %v6580_v63 = vadd.f32 %v5184_v58, %v6478_v52  ;;  %v5455_v2 = vpop.eup %5454  ;;  %v3797_v4 = vmul.f32 %v3765_v46, %v3669_v59  ;;  %v5185_v6 = vadd.f32 %v5147_v0, %v4947_v53  ;;  %v1968_v54 = vpop.f32.mrb[21].mxu1 }
 0x1f2   : > { %v3710_v5 = vmul.f32 0.70710677, %v6577_v60  ;;  %v3529_v7 = vpop.f32.mrb[21].mxu0  ;;  %v5457_v47 = vpop.eup %5456  ;;  %3831 = vst.msk [vmem:[%s6501_s13 + $0x58] sm:$0xff] %vm3819_vm2, %v3798_v62  ;;  %v3768_v57 = vadd.f32 1.0, %v5455_v2  ;;  %v3678_v2 = vmul.f32 0.5, %v6577_v60 }
 0x1f3   : > { %v3709_v28 = vmul.f32 0.70710677, %v6580_v63  ;;  %v5186_v48 = vadd.f32 %v3529_v7, %v1968_v54  ;;  %3830 = vst.msk [vmem:[%s6501_s13 + $0x50] sm:$0xff] %vm3819_vm2, %v3797_v4  ;;  %v3767_v8 = vadd.f32 1.0, %v5457_v47  ;;  %v6591_v25 = vadd.f32 %v5185_v6, %v6478_v52 }
 0x1f4   : > { %5466 = verf.f32 %v3710_v5  ;;  %v3800_v11 = vmul.f32 %v3768_v57, %v3672_v55  ;;  %v4950_v9 = vpop.f32.mrb[22].mxu1  ;;  %v5150_v15 = vpop.f32.mrb[22].mxu0  ;;  %v3677_v54 = vmul.f32 0.5, %v6580_v63 }
 0x1f5   : > { %5468 = verf.f32 %v3709_v28  ;;  %v6594_v13 = vadd.f32 %v5186_v48, %v6478_v52  ;;  %v5459_v17 = vpop.eup %5458  ;;  %v3799_v19 = vmul.f32 %v3767_v8, %v3671_v24  ;;  %v3712_v37 = vmul.f32 0.70710677, %v6591_v25  ;;  %v1978_v10 = vpop.f32.mrb[23].mxu1 }
 0x1f6   : > { %v5187_v33 = vadd.f32 %v5150_v15, %v4950_v9  ;;  %v3539_v12 = vpop.f32.mrb[23].mxu0  ;;  %v5461_v16 = vpop.eup %5460  ;;  %3833 = vst.msk [vmem:[%s6501_s13 + $0x68] sm:$0xff] %vm3819_vm2, %v3800_v11  ;;  %v3770_v50 = vadd.f32 1.0, %v5459_v17  ;;  %v3680_v17 = vmul.f32 0.5, %v6591_v25 }
 0x1f7   : > { %v3711_v1 = vmul.f32 0.70710677, %v6594_v13  ;;  %v5188_v3 = vadd.f32 %v3539_v12, %v1978_v10  ;;  %3832 = vst.msk [vmem:[%s6501_s13 + $0x60] sm:$0xff] %vm3819_vm2, %v3799_v19  ;;  %v3769_v61 = vadd.f32 1.0, %v5461_v16  ;;  %5470 = verf.f32 %v3712_v37 }
 0x1f8   : > { %v6605_v14 = vadd.f32 %v5187_v33, %v6478_v52  ;;  %v3802_v18 = vmul.f32 %v3770_v50, %v3674_v20  ;;  %v4953_v49 = vpop.f32.mrb[24].mxu1  ;;  %v5153_v26 = vpop.f32.mrb[24].mxu0  ;;  %v3679_v10 = vmul.f32 0.5, %v6594_v13 }
 0x1f9   : > { %5472 = verf.f32 %v3711_v1  ;;  %v6608_v23 = vadd.f32 %v5188_v3, %v6478_v52  ;;  %v5463_v29 = vpop.eup %5462  ;;  %v3801_v31 = vmul.f32 %v3769_v61, %v3673_v22  ;;  %v5189_v35 = vadd.f32 %v5153_v26, %v4953_v49  ;;  %v1988_v21 = vpop.f32.mrb[25].mxu1 }
 0x1fa   : > { %v3714_v32 = vmul.f32 0.70710677, %v6605_v14  ;;  %v3549_v27 = vpop.f32.mrb[25].mxu0  ;;  %3835 = vst.msk [vmem:[%s6501_s13 + $0x78] sm:$0xff] %vm3819_vm2, %v3802_v18  ;;  %v3772_v40 = vadd.f32 1.0, %v5463_v29  ;;  %v3682_v13 = vmul.f32 0.5, %v6605_v14 }
 0x1fb   : > { %v5465_v38 = vpop.eup %5464  ;;  %v3713_v41 = vmul.f32 0.70710677, %v6608_v23  ;;  %v5190_v42 = vadd.f32 %v3549_v27, %v1988_v21  ;;  %3834 = vst.msk [vmem:[%s6501_s13 + $0x70] sm:$0xff] %vm3819_vm2, %v3801_v31  ;;  %v6619_v44 = vadd.f32 %v5189_v35, %v6478_v52  ;;  %v3681_v21 = vmul.f32 0.5, %v6608_v23 }
 0x1fc   : > { %v3771_v43 = vadd.f32 1.0, %v5465_v38  ;;  %5474 = verf.f32 %v3714_v32  ;;  %v3804_v51 = vmul.f32 %v3772_v40, %v3676_v39  ;;  %v4956_v34 = vpop.f32.mrb[26].mxu1  ;;  %v5156_v56 = vpop.f32.mrb[26].mxu0 }
 0x1fd   : > { %5476 = verf.f32 %v3713_v41  ;;  %v6622_v45 = vadd.f32 %v5190_v42, %v6478_v52  ;;  %v3716_v46 = vmul.f32 0.70710677, %v6619_v44  ;;  %v5191_v62 = vadd.f32 %v5156_v56, %v4956_v34  ;;  %v1998_v36 = vpop.f32.mrb[27].mxu1  ;;  %v3559_v53 = vpop.f32.mrb[27].mxu0 }
 0x1fe   : > { %v5467_v58 = vpop.eup %5466  ;;  %v3803_v59 = vmul.f32 %v3771_v43, %v3675_v30  ;;  %3837 = vst.msk [vmem:[%s6501_s13 + $0x88] sm:$0xff] %vm3819_vm2, %v3804_v51  ;;  %v5192_v6 = vadd.f32 %v3559_v53, %v1998_v36  ;;  %v3684_v43 = vmul.f32 0.5, %v6619_v44 }
 0x1ff   : > { %v5469_v0 = vpop.eup %5468  ;;  %v3774_v4 = vadd.f32 1.0, %v5467_v58  ;;  %v3715_v5 = vmul.f32 0.70710677, %v6622_v45  ;;  %5478 = verf.f32 %v3716_v46  ;;  %v6633_v47 = vadd.f32 %v5191_v62, %v6478_v52 }
 0x200   : > { %3836 = vst.msk [vmem:[%s6501_s13 + $0x80] sm:$0xff] %vm3819_vm2, %v3803_v59  ;;  %v3773_v7 = vadd.f32 1.0, %v5469_v0  ;;  %v6636_v57 = vadd.f32 %v5192_v6, %v6478_v52  ;;  %v4959_v60 = vpop.f32.mrb[28].mxu1  ;;  %v5159_v28 = vpop.f32.mrb[28].mxu0  ;;  %v3683_v34 = vmul.f32 0.5, %v6622_v45 }
 0x201   : > { %v3806_v55 = vmul.f32 %v3774_v4, %v3678_v2  ;;  %5480 = verf.f32 %v3715_v5  ;;  %v5471_v48 = vpop.eup %5470  ;;  %v3718_v8 = vmul.f32 0.70710677, %v6633_v47  ;;  %v5193_v11 = vadd.f32 %v5159_v28, %v4959_v60  ;;  %v2008_v63 = vpop.f32.mrb[29].mxu1 }
 0x202   : > { %v3805_v24 = vmul.f32 %v3773_v7, %v3677_v54  ;;  %v3569_v9 = vpop.f32.mrb[29].mxu0  ;;  %v3776_v19 = vadd.f32 1.0, %v5471_v48  ;;  %v3717_v37 = vmul.f32 0.70710677, %v6636_v57  ;;  %v3686_v62 = vmul.f32 0.5, %v6633_v47 }
 0x203   : > { %v5473_v15 = vpop.eup %5472  ;;  %3839 = vst.msk [vmem:[%s6501_s13 + $0x98] sm:$0xff] %vm3819_vm2, %v3806_v55  ;;  %v5194_v33 = vadd.f32 %v3569_v9, %v2008_v63  ;;  %5482 = verf.f32 %v3718_v8  ;;  %v3656_v16 = vadd.f32 %v5193_v11, %v6478_v52  ;;  %v3685_v36 = vmul.f32 0.5, %v6636_v57 }
 0x204   : > { %3838 = vst.msk [vmem:[%s6501_s13 + $0x90] sm:$0xff] %vm3819_vm2, %v3805_v24  ;;  %v3775_v12 = vadd.f32 1.0, %v5473_v15  ;;  %v3808_v20 = vmul.f32 %v3776_v19, %v3680_v17  ;;  %5484 = verf.f32 %v3717_v37  ;;  %v4962_v1 = vpop.f32.mrb[30].mxu1  ;;  %v5162_v25 = vpop.f32.mrb[30].mxu0 }
 0x205   : > { %v3655_v50 = vadd.f32 %v5194_v33, %v6478_v52  ;;  %v3720_v61 = vmul.f32 0.70710677, %v3656_v16  ;;  %v5195_v18 = vadd.f32 %v5162_v25, %v4962_v1  ;;  %v2018_v49 = vpop.f32.mrb[31].mxu1  ;;  %v3579_v26 = vpop.f32.mrb[31].mxu0  ;;  %v3688_v5 = vmul.f32 0.5, %v3656_v16 }
 0x206   : > { %v5475_v3 = vpop.eup %5474  ;;  %v3807_v22 = vmul.f32 %v3775_v12, %v3679_v10  ;;  %3841 = vst.msk [vmem:[%s6501_s13 + $0xa8] sm:$0xff] %vm3819_vm2, %v3808_v20  ;;  %v5196_v35 = vadd.f32 %v3579_v26, %v2018_v49 }
 0x207   : > { %v5477_v29 = vpop.eup %5476  ;;  %v3778_v31 = vadd.f32 1.0, %v5475_v3  ;;  %v3719_v32 = vmul.f32 0.70710677, %v3655_v50  ;;  %5486 = verf.f32 %v3720_v61  ;;  %v3658_v38 = vadd.f32 %v5195_v18, %v6478_v52 }
 0x208   : > { %3840 = vst.msk [vmem:[%s6501_s13 + $0xa0] sm:$0xff] %vm3819_vm2, %v3807_v22  ;;  %v3777_v27 = vadd.f32 1.0, %v5477_v29  ;;  %v3657_v40 = vadd.f32 %v5196_v35, %v6478_v52  ;;  %v3687_v54 = vmul.f32 0.5, %v3655_v50 }
 0x209   : > { %v3810_v39 = vmul.f32 %v3778_v31, %v3682_v13  ;;  %5488 = verf.f32 %v3719_v32  ;;  %v5479_v41 = vpop.eup %5478  ;;  %v3722_v14 = vmul.f32 0.70710677, %v3658_v38  ;;  %v3690_v28 = vmul.f32 0.5, %v3658_v38 }
 0x20a   : > { %v3809_v42 = vmul.f32 %v3777_v27, %v3681_v21  ;;  %v3780_v51 = vadd.f32 1.0, %v5479_v41  ;;  %v3721_v23 = vmul.f32 0.70710677, %v3657_v40  ;;  %v3689_v24 = vmul.f32 0.5, %v3657_v40 }
 0x20b   : > { %v5481_v30 = vpop.eup %5480  ;;  %3843 = vst.msk [vmem:[%s6501_s13 + $0xb8] sm:$0xff] %vm3819_vm2, %v3810_v39  ;;  %5490 = verf.f32 %v3722_v14 }
 0x20c   : > { %3842 = vst.msk [vmem:[%s6501_s13 + $0xb0] sm:$0xff] %vm3819_vm2, %v3809_v42  ;;  %v3779_v56 = vadd.f32 1.0, %v5481_v30  ;;  %v3812_v52 = vmul.f32 %v3780_v51, %v3684_v43  ;;  %5492 = verf.f32 %v3721_v23 }
 0x20d   : > { %v5483_v58 = vpop.eup %5482 }
 0x20e   : > { %v3811_v59 = vmul.f32 %v3779_v56, %v3683_v34  ;;  %v5485_v46 = vpop.eup %5484  ;;  %3845 = vst.msk [vmem:[%s6501_s13 + $0xc8] sm:$0xff] %vm3819_vm2, %v3812_v52  ;;  %v3782_v44 = vadd.f32 1.0, %v5483_v58 }
 0x20f   : > { %v3781_v45 = vadd.f32 1.0, %v5485_v46 }
 0x210   : > { %3844 = vst.msk [vmem:[%s6501_s13 + $0xc0] sm:$0xff] %vm3819_vm2, %v3811_v59  ;;  %v3814_v53 = vmul.f32 %v3782_v44, %v3686_v62 }
 0x211   : > { %v5487_v0 = vpop.eup %5486  ;;  %v3813_v2 = vmul.f32 %v3781_v45, %v3685_v36 }
 0x212   : > { %3847 = vst.msk [vmem:[%s6501_s13 + $0xd8] sm:$0xff] %vm3819_vm2, %v3814_v53  ;;  %v3784_v6 = vadd.f32 1.0, %v5487_v0 }
 0x213   : > { %v5489_v4 = vpop.eup %5488  ;;  %3846 = vst.msk [vmem:[%s6501_s13 + $0xd0] sm:$0xff] %vm3819_vm2, %v3813_v2 }
 0x214   : > { %v3783_v7 = vadd.f32 1.0, %v5489_v4  ;;  %v3816_v47 = vmul.f32 %v3784_v6, %v3688_v5 }
 0x215   : > { %v5491_v55 = vpop.eup %5490 }
 0x216   : > { %v3815_v57 = vmul.f32 %v3783_v7, %v3687_v54  ;;  %v5493_v60 = vpop.eup %5492  ;;  %3849 = vst.msk [vmem:[%s6501_s13 + $0xe8] sm:$0xff] %vm3819_vm2, %v3816_v47  ;;  %v3786_v48 = vadd.f32 1.0, %v5491_v55 }
 0x217   : > { %v3785_v8 = vadd.f32 1.0, %v5493_v60 }
 0x218   : > { %3848 = vst.msk [vmem:[%s6501_s13 + $0xe0] sm:$0xff] %vm3819_vm2, %v3815_v57  ;;  %v3818_v11 = vmul.f32 %v3786_v48, %v3690_v28 }
 0x219   : > { %v3817_v63 = vmul.f32 %v3785_v8, %v3689_v24 }
 0x21a   : > { %3851 = vst.msk [vmem:[%s6501_s13 + $0xf8] sm:$0xff] %vm3819_vm2, %v3818_v11 }
 0x21b   : > { %3850 = vst.msk [vmem:[%s6501_s13 + $0xf0] sm:$0xff] %vm3819_vm2, %v3817_v63 }
 0x21c PF: > { %s13_s12 = sadd.s32 1, %s5500_s12  }
 0x21d   : > { %p10_p4 = scmp.ge.s32.totalorder %s13_s12, 4  }
 0x21f   :  { %12 = sbr.rel (!%p10_p4) target bundleno = 1 (0x1), region = 72 }

</bundles_post_ra>
